<compile_context>
chip_gen: v5e
topology: v5e:2x2
jax: 0.10.0
libtpu: 0.0.40
codegen_flags: <defaults>
</compile_context>

<pallas_src>
import math

import jax
import jax.numpy as jnp
from jax.experimental import pallas as pl
from jax.experimental.pallas import tpu as pltpu

# ----------------------------- synthetic config -----------------------------
VOCAB = 64
MAX_POS = 16
TYPE_VOCAB = 2
HIDDEN = 32
NUM_HEADS = 2
HEAD_DIM = HIDDEN // NUM_HEADS
FFN = 4 * HIDDEN          # 128: lane-dense FFN path
NUM_LAYERS = 2
LN_EPS = 1e-12            # BERT default

AUX_W = 128               # lane width of the packed per-layer vector array
# rows of the packed "aux" array (per layer, shape (8, 128)):
#   0: bqkv (3H)   1: b1 (FFN)   2: bo   3: ln1_g   4: ln1_b
#   5: b2          6: ln2_g      7: ln2_b
ENCODER_WEIGHT_KEYS = ("wqkv", "wo", "w1", "w2", "aux")


# ------------------------------ small helpers -------------------------------
def _layer_norm(x, gamma, beta, eps=LN_EPS):
    mean = jnp.mean(x, axis=-1, keepdims=True)
    var = jnp.mean((x - mean) ** 2, axis=-1, keepdims=True)
    return (x - mean) * jax.lax.rsqrt(var + eps) * gamma + beta


def _gelu(x):
    # TODO(synk): tanh-approx GELU; HF BERT default is the exact erf-based gelu.
    c = math.sqrt(2.0 / math.pi)
    return 0.5 * x * (1.0 + jnp.tanh(c * (x + 0.044715 * x * x * x)))


# --------------------------- fused encoder kernel ---------------------------
def fused_encoder_kernel(x_ref, neg_ref,
                         wqkv_ref, wo_ref, w1_ref, w2_ref, aux_ref,
                         pooled_ref):
    # One grid step == one encoder (query or context). All layers run here.
    B, S, H = x_ref.shape
    L = wqkv_ref.shape[0]
    D = HEAD_DIM
    scale = 1.0 / math.sqrt(D)

    # Activations stay on-chip for the whole stack; batch folded into rows.
    x2 = x_ref[...].astype(jnp.float32).reshape(B * S, H)          # (B*S, H)
    # Hoisted mask broadcast: read once, broadcast once (not per layer/head).
    neg = jnp.broadcast_to(neg_ref[...].astype(jnp.float32), (B, S, S))

    for l in range(L):                                             # static unroll
        wo_l = wo_ref[l]                                           # (H, H) bf16
        aux = aux_ref[l]                                           # (8, 128) f32
        bqkv = aux[0:1, :3 * H]
        b1 = aux[1:2, :FFN]
        bo, ln1_g, ln1_b = aux[2:3, :H], aux[3:4, :H], aux[4:5, :H]
        b2, ln2_g, ln2_b = aux[5:6, :H], aux[6:7, :H], aux[7:8, :H]

        # Fused QKV projection over the whole batch: (B*S, H) @ (H, 3H).
        qkv = jnp.dot(x2.astype(jnp.bfloat16), wqkv_ref[l],
                      preferred_element_type=jnp.float32) + bqkv

        # Multi-head attention; heads merged by accumulating against the
        # row-split output projection (no lane-concat of head outputs).
        attn = None
        for h in range(NUM_HEADS):                                 # static unroll
            qh = qkv[:, h * D:(h + 1) * D].reshape(B, S, D)
            kh = qkv[:, H + h * D:H + (h + 1) * D].reshape(B, S, D)
            vh = qkv[:, 2 * H + h * D:2 * H + (h + 1) * D].reshape(B, S, D)

            s = jnp.einsum('bqd,bkd->bqk',
                           qh.astype(jnp.bfloat16), kh.astype(jnp.bfloat16),
                           preferred_element_type=jnp.float32) * scale + neg
            m = jnp.max(s, axis=-1, keepdims=True)
            p = jnp.exp(s - m)
            p = p * pl.reciprocal(jnp.sum(p, axis=-1, keepdims=True), approx=True)
            ctx = jnp.einsum('bqk,bkd->bqd',
                             p.astype(jnp.bfloat16), vh.astype(jnp.bfloat16),
                             preferred_element_type=jnp.float32)   # (B, S, D)
            part = jnp.dot(ctx.reshape(B * S, D).astype(jnp.bfloat16),
                           wo_l[h * D:(h + 1) * D, :],
                           preferred_element_type=jnp.float32)     # (B*S, H)
            attn = part if attn is None else attn + part

        x2 = _layer_norm(x2 + attn + bo, ln1_g, ln1_b)

        # FFN (lane-dense FFN=128 intermediate).
        h1 = _gelu(jnp.dot(x2.astype(jnp.bfloat16), w1_ref[l],
                           preferred_element_type=jnp.float32) + b1)
        h2 = jnp.dot(h1.astype(jnp.bfloat16), w2_ref[l],
                     preferred_element_type=jnp.float32) + b2
        x2 = _layer_norm(x2 + h2, ln2_g, ln2_b)

    # CLS pooling (representation_token_pos = 0) done in-kernel.
    pooled_ref[...] = x2.reshape(B, S, H)[:, 0, :].astype(pooled_ref.dtype)


def fused_biencoder(x, neg, stacked):
    """x: (2, B, S, H) embeddings; neg: (2, B, 1, S) additive mask;
    stacked: dict of per-encoder-stacked weights. Returns CLS pooled (2, B, H)."""
    E, B, S, H = x.shape

    def spec(arr):
        return pl.BlockSpec((None,) + tuple(arr.shape[1:]),
                            lambda e, _nd=arr.ndim: (e,) + (0,) * (_nd - 1))

    weights = [stacked[k] for k in ENCODER_WEIGHT_KEYS]
    return pl.pallas_call(
        fused_encoder_kernel,
        out_shape=jax.ShapeDtypeStruct((E, B, H), jnp.float32),
        grid=(E,),
        in_specs=[spec(x), spec(neg)] + [spec(w) for w in weights],
        out_specs=pl.BlockSpec((None, B, H), lambda e: (e, 0, 0)),
        compiler_params=pltpu.CompilerParams(dimension_semantics=("parallel",)),
    )(x, neg, *weights)


# ------------------------------- plain-JAX glue -------------------------------
def embed(params, ids, segments):
    S = ids.shape[1]
    emb = (params["word_emb"][ids]
           + params["pos_emb"][:S][None, :, :]
           + params["type_emb"][segments])
    return _layer_norm(emb, params["emb_ln_g"], params["emb_ln_b"])


@jax.jit
def bi_encoder_product_forward(query_params, context_params, w_cls, b_cls,
                               query_ids, query_segments, query_attention_mask,
                               context_ids, context_segments, context_attention_mask):
    # Stack both encoders along a leading axis so one pallas_call does everything.
    x = jnp.stack([embed(query_params, query_ids, query_segments),
                   embed(context_params, context_ids, context_segments)])     # (2,B,S,H)
    neg = jnp.stack([
        (1.0 - query_attention_mask.astype(jnp.float32))[:, None, :],
        (1.0 - context_attention_mask.astype(jnp.float32))[:, None, :]]) * -1e9  # (2,B,1,S)
    stacked = {k: jnp.stack([query_params[k], context_params[k]])
               for k in ENCODER_WEIGHT_KEYS}

    pooled = fused_biencoder(x, neg, stacked)            # (2, B, H) CLS vectors
    # Classifier head is a (B,H)x(H,2) matmul — left to XLA (kernel launch would
    # be pure overhead and force a last-dim-2 masked store).
    return jnp.dot(pooled[0] * pooled[1], w_cls) + b_cls


# --------------------------- deterministic params ----------------------------
def _pad_lane(v, width=AUX_W):
    return jnp.pad(v, (0, width - v.shape[0]))


def init_encoder_params(key):
    def dense(k, shape):
        return jax.random.normal(k, shape, jnp.float32) * 0.02

    keys = jax.random.split(key, 3 + NUM_LAYERS * 6)
    ki = iter(keys)
    word_emb = dense(next(ki), (VOCAB, HIDDEN))
    pos_emb = dense(next(ki), (MAX_POS, HIDDEN))
    type_emb = dense(next(ki), (TYPE_VOCAB, HIDDEN))

    wqkv_l, wo_l, w1_l, w2_l = [], [], [], []
    for _ in range(NUM_LAYERS):
        wq = dense(next(ki), (HIDDEN, HIDDEN))
        wk = dense(next(ki), (HIDDEN, HIDDEN))
        wv = dense(next(ki), (HIDDEN, HIDDEN))
        wo = dense(next(ki), (HIDDEN, HIDDEN))
        w1 = dense(next(ki), (HIDDEN, FFN))
        w2 = dense(next(ki), (FFN, HIDDEN))
        wqkv_l.append(jnp.concatenate([wq, wk, wv], axis=1))   # (H, 3H)
        wo_l.append(wo); w1_l.append(w1); w2_l.append(w2)

    # Packed per-layer bias/LN vectors -> one lane-dense (8, 128) f32 tile:
    #   bqkv, b1, bo, ln1_g, ln1_b, b2, ln2_g, ln2_b   (zeros / ones init).
    aux_rows = jnp.stack([
        _pad_lane(jnp.zeros((3 * HIDDEN,))),   # bqkv
        _pad_lane(jnp.zeros((FFN,))),          # b1
        _pad_lane(jnp.zeros((HIDDEN,))),       # bo
        _pad_lane(jnp.ones((HIDDEN,))),        # ln1_g
        _pad_lane(jnp.zeros((HIDDEN,))),       # ln1_b
        _pad_lane(jnp.zeros((HIDDEN,))),       # b2
        _pad_lane(jnp.ones((HIDDEN,))),        # ln2_g
        _pad_lane(jnp.zeros((HIDDEN,))),       # ln2_b
    ]).astype(jnp.float32)                     # (8, 128)

    return {
        "word_emb": word_emb, "pos_emb": pos_emb, "type_emb": type_emb,
        "emb_ln_g": jnp.ones((HIDDEN,), jnp.float32),
        "emb_ln_b": jnp.zeros((HIDDEN,), jnp.float32),
        # bf16 matmul weights (f32 accumulation in-kernel); f32 packed vectors.
        "wqkv": jnp.stack(wqkv_l).astype(jnp.bfloat16),        # (L, H, 3H)
        "wo":   jnp.stack(wo_l).astype(jnp.bfloat16),          # (L, H, H)
        "w1":   jnp.stack(w1_l).astype(jnp.bfloat16),          # (L, H, FFN)
        "w2":   jnp.stack(w2_l).astype(jnp.bfloat16),          # (L, FFN, H)
        "aux":  jnp.tile(aux_rows[None], (NUM_LAYERS, 1, 1)),  # (L, 8, 128)
    }


# ---------------------------------- main -------------------------------------
if __name__ == "__main__":
    key = jax.random.PRNGKey(0)
    k_q, k_c, k_cls, k_ids1, k_ids2 = jax.random.split(key, 5)

    query_params = init_encoder_params(k_q)
    context_params = init_encoder_params(k_c)
    w_cls = jax.random.normal(k_cls, (HIDDEN, 2), jnp.float32) * 0.02
    b_cls = jnp.zeros((2,), jnp.float32)

    B, S = 2, 8
    query_ids = jax.random.randint(k_ids1, (B, S), 0, VOCAB, dtype=jnp.int32)
    context_ids = jax.random.randint(k_ids2, (B, S), 0, VOCAB, dtype=jnp.int32)
    query_segments = jnp.zeros((B, S), jnp.int32)
    context_segments = jnp.zeros((B, S), jnp.int32)
    query_attention_mask = jnp.ones((B, S), jnp.int32)
    context_attention_mask = jnp.ones((B, S), jnp.int32).at[:, -2:].set(0)

    out = bi_encoder_product_forward(
        query_params, context_params, w_cls, b_cls,
        query_ids, query_segments, query_attention_mask,
        context_ids, context_segments, context_attention_mask)
    out = jax.block_until_ready(out)
    assert out.shape == (B, 2) and out.dtype == jnp.float32
    print("KERNEL_OK")
</pallas_src>

<mosaic_0001>
module attributes {stable_mosaic.version = 11 : i64} {
  func.func @fused_encoder_kernel(%arg0: i32, %arg1: memref<1x2x8x32xf32, #tpu.memory_space<vmem>>, %arg2: memref<1x2x1x8xf32, #tpu.memory_space<vmem>>, %arg3: memref<1x2x32x96xbf16, #tpu.memory_space<vmem>>, %arg4: memref<1x2x32x32xbf16, #tpu.memory_space<vmem>>, %arg5: memref<1x2x32x128xbf16, #tpu.memory_space<vmem>>, %arg6: memref<1x2x128x32xbf16, #tpu.memory_space<vmem>>, %arg7: memref<1x2x8x128xf32, #tpu.memory_space<vmem>>, %arg8: memref<1x2x32xf32, #tpu.memory_space<vmem>>) attributes {dimension_semantics = [#tpu.dimension_semantics<parallel>], iteration_bounds = array<i64: 2>, scalar_prefetch = 0 : i64, scratch_operands = 0 : i64, tpu.core_type = #tpu.core_type<tc>, window_params = [{transform_indices = @transform_0, window_bounds = array<i64: 1, 2, 8, 32>}, {transform_indices = @transform_1, window_bounds = array<i64: 1, 2, 1, 8>}, {transform_indices = @transform_2, window_bounds = array<i64: 1, 2, 32, 96>}, {transform_indices = @transform_3, window_bounds = array<i64: 1, 2, 32, 32>}, {transform_indices = @transform_4, window_bounds = array<i64: 1, 2, 32, 128>}, {transform_indices = @transform_5, window_bounds = array<i64: 1, 2, 128, 32>}, {transform_indices = @transform_6, window_bounds = array<i64: 1, 2, 8, 128>}, {transform_indices = @transform_7, window_bounds = array<i64: 1, 2, 32>}]} {
    %c0 = arith.constant 0 : index
    %c0_0 = arith.constant 0 : index
    %c0_1 = arith.constant 0 : index
    %c0_2 = arith.constant 0 : index
    %0 = vector.load %arg1[%c0, %c0_0, %c0_1, %c0_2] : memref<1x2x8x32xf32, #tpu.memory_space<vmem>>, vector<1x2x8x32xf32>
    %1 = vector.shape_cast %0 : vector<1x2x8x32xf32> to vector<2x8x32xf32>
    %2 = vector.shape_cast %1 : vector<2x8x32xf32> to vector<16x32xf32>
    %c0_3 = arith.constant 0 : index
    %c0_4 = arith.constant 0 : index
    %c0_5 = arith.constant 0 : index
    %c0_6 = arith.constant 0 : index
    %3 = vector.load %arg2[%c0_3, %c0_4, %c0_5, %c0_6] : memref<1x2x1x8xf32, #tpu.memory_space<vmem>>, vector<1x2x1x8xf32>
    %4 = vector.shape_cast %3 : vector<1x2x1x8xf32> to vector<2x1x8xf32>
    %5 = vector.shape_cast %4 : vector<2x1x8xf32> to vector<2x1x8xf32>
    %6 = vector.broadcast %5 : vector<2x1x8xf32> to vector<2x8x8xf32>
    %c0_7 = arith.constant 0 : index
    %c0_8 = arith.constant 0 : index
    %c0_9 = arith.constant 0 : index
    %c0_10 = arith.constant 0 : index
    %7 = vector.load %arg4[%c0_7, %c0_8, %c0_9, %c0_10] : memref<1x2x32x32xbf16, #tpu.memory_space<vmem>>, vector<1x1x32x32xbf16>
    %8 = vector.shape_cast %7 : vector<1x1x32x32xbf16> to vector<32x32xbf16>
    %c0_11 = arith.constant 0 : index
    %c0_12 = arith.constant 0 : index
    %c0_13 = arith.constant 0 : index
    %c0_14 = arith.constant 0 : index
    %9 = vector.load %arg7[%c0_11, %c0_12, %c0_13, %c0_14] : memref<1x2x8x128xf32, #tpu.memory_space<vmem>>, vector<1x1x8x128xf32>
    %10 = vector.shape_cast %9 : vector<1x1x8x128xf32> to vector<8x128xf32>
    %11 = vector.extract_strided_slice %10 {offsets = [0, 0], sizes = [1, 96], strides = [1, 1]} : vector<8x128xf32> to vector<1x96xf32>
    %12 = vector.extract_strided_slice %10 {offsets = [1, 0], sizes = [1, 128], strides = [1, 1]} : vector<8x128xf32> to vector<1x128xf32>
    %13 = vector.extract_strided_slice %10 {offsets = [2, 0], sizes = [1, 32], strides = [1, 1]} : vector<8x128xf32> to vector<1x32xf32>
    %14 = vector.extract_strided_slice %10 {offsets = [3, 0], sizes = [1, 32], strides = [1, 1]} : vector<8x128xf32> to vector<1x32xf32>
    %15 = vector.extract_strided_slice %10 {offsets = [4, 0], sizes = [1, 32], strides = [1, 1]} : vector<8x128xf32> to vector<1x32xf32>
    %16 = vector.extract_strided_slice %10 {offsets = [5, 0], sizes = [1, 32], strides = [1, 1]} : vector<8x128xf32> to vector<1x32xf32>
    %17 = vector.extract_strided_slice %10 {offsets = [6, 0], sizes = [1, 32], strides = [1, 1]} : vector<8x128xf32> to vector<1x32xf32>
    %18 = vector.extract_strided_slice %10 {offsets = [7, 0], sizes = [1, 32], strides = [1, 1]} : vector<8x128xf32> to vector<1x32xf32>
    %19 = arith.truncf %2 : vector<16x32xf32> to vector<16x32xbf16>
    %c0_15 = arith.constant 0 : index
    %c0_16 = arith.constant 0 : index
    %c0_17 = arith.constant 0 : index
    %c0_18 = arith.constant 0 : index
    %20 = vector.load %arg3[%c0_15, %c0_16, %c0_17, %c0_18] : memref<1x2x32x96xbf16, #tpu.memory_space<vmem>>, vector<1x1x32x96xbf16>
    %21 = vector.shape_cast %20 : vector<1x1x32x96xbf16> to vector<32x96xbf16>
    %cst = arith.constant dense<0.000000e+00> : vector<16x96xf32>
    %22 = tpu.matmul %19, %21, %cst {dimension_numbers = #tpu.dot_dimension_numbers<[1], [0], [0], [1], [0, 0, 1, 1], [], []>} : vector<16x32xbf16>, vector<32x96xbf16>, vector<16x96xf32> -> vector<16x96xf32>
    %23 = vector.broadcast %11 : vector<1x96xf32> to vector<16x96xf32>
    %24 = arith.addf %22, %23 : vector<16x96xf32>
    %25 = vector.extract_strided_slice %24 {offsets = [0, 0], sizes = [16, 16], strides = [1, 1]} : vector<16x96xf32> to vector<16x16xf32>
    %26 = vector.shape_cast %25 : vector<16x16xf32> to vector<2x8x16xf32>
    %27 = vector.extract_strided_slice %24 {offsets = [0, 32], sizes = [16, 16], strides = [1, 1]} : vector<16x96xf32> to vector<16x16xf32>
    %28 = vector.shape_cast %27 : vector<16x16xf32> to vector<2x8x16xf32>
    %29 = vector.extract_strided_slice %24 {offsets = [0, 64], sizes = [16, 16], strides = [1, 1]} : vector<16x96xf32> to vector<16x16xf32>
    %30 = vector.shape_cast %29 : vector<16x16xf32> to vector<2x8x16xf32>
    %31 = arith.truncf %26 : vector<2x8x16xf32> to vector<2x8x16xbf16>
    %32 = arith.truncf %28 : vector<2x8x16xf32> to vector<2x8x16xbf16>
    "tpu.trace_start"() <{level = 10 : i32, message = "bqd,bkd->bqk"}> : () -> ()
    %cst_19 = arith.constant dense<0.000000e+00> : vector<2x8x8xf32>
    %33 = tpu.matmul %31, %32, %cst_19 {dimension_numbers = #tpu.dot_dimension_numbers<[2], [2], [1], [1], [0, 0, 0, 1, 1, 1], [0], [0]>} : vector<2x8x16xbf16>, vector<2x8x16xbf16>, vector<2x8x8xf32> -> vector<2x8x8xf32>
    "tpu.trace_stop"() : () -> ()
    %cst_20 = arith.constant 2.500000e-01 : f32
    %34 = vector.broadcast %cst_20 : f32 to vector<2x8x8xf32>
    %35 = arith.mulf %33, %34 : vector<2x8x8xf32>
    %36 = arith.addf %35, %6 : vector<2x8x8xf32>
    %cst_21 = arith.constant dense<0xFF800000> : vector<2x8xf32>
    %37 = vector.multi_reduction <maximumf>, %36, %cst_21 [2] : vector<2x8x8xf32> to vector<2x8xf32>
    %38 = vector.shape_cast %37 : vector<2x8xf32> to vector<2x8x1xf32>
    %39 = vector.broadcast %38 : vector<2x8x1xf32> to vector<2x8x8xf32>
    %40 = arith.subf %36, %39 : vector<2x8x8xf32>
    %41 = math.exp %40 : vector<2x8x8xf32>
    %cst_22 = arith.constant dense<0.000000e+00> : vector<2x8xf32>
    %42 = vector.multi_reduction <add>, %41, %cst_22 [2] : vector<2x8x8xf32> to vector<2x8xf32>
    %43 = vector.shape_cast %42 : vector<2x8xf32> to vector<2x8x1xf32>
    %44 = tpu.reciprocal %43 {approx = true} : vector<2x8x1xf32> -> vector<2x8x1xf32>
    %45 = vector.broadcast %44 : vector<2x8x1xf32> to vector<2x8x8xf32>
    %46 = arith.mulf %41, %45 : vector<2x8x8xf32>
    %47 = arith.truncf %46 : vector<2x8x8xf32> to vector<2x8x8xbf16>
    %48 = arith.truncf %30 : vector<2x8x16xf32> to vector<2x8x16xbf16>
    "tpu.trace_start"() <{level = 10 : i32, message = "bqk,bkd->bqd"}> : () -> ()
    %cst_23 = arith.constant dense<0.000000e+00> : vector<2x8x16xf32>
    %49 = tpu.matmul %47, %48, %cst_23 {dimension_numbers = #tpu.dot_dimension_numbers<[2], [1], [1], [2], [0, 0, 0, 1, 1, 2], [0], [0]>} : vector<2x8x8xbf16>, vector<2x8x16xbf16>, vector<2x8x16xf32> -> vector<2x8x16xf32>
    "tpu.trace_stop"() : () -> ()
    %50 = vector.shape_cast %49 : vector<2x8x16xf32> to vector<16x16xf32>
    %51 = arith.truncf %50 : vector<16x16xf32> to vector<16x16xbf16>
    %52 = vector.extract_strided_slice %8 {offsets = [0, 0], sizes = [16, 32], strides = [1, 1]} : vector<32x32xbf16> to vector<16x32xbf16>
    %cst_24 = arith.constant dense<0.000000e+00> : vector<16x32xf32>
    %53 = tpu.matmul %51, %52, %cst_24 {dimension_numbers = #tpu.dot_dimension_numbers<[1], [0], [0], [1], [0, 0, 1, 1], [], []>} : vector<16x16xbf16>, vector<16x32xbf16>, vector<16x32xf32> -> vector<16x32xf32>
    %54 = vector.extract_strided_slice %24 {offsets = [0, 16], sizes = [16, 16], strides = [1, 1]} : vector<16x96xf32> to vector<16x16xf32>
    %55 = vector.shape_cast %54 : vector<16x16xf32> to vector<2x8x16xf32>
    %56 = vector.extract_strided_slice %24 {offsets = [0, 48], sizes = [16, 16], strides = [1, 1]} : vector<16x96xf32> to vector<16x16xf32>
    %57 = vector.shape_cast %56 : vector<16x16xf32> to vector<2x8x16xf32>
    %58 = vector.extract_strided_slice %24 {offsets = [0, 80], sizes = [16, 16], strides = [1, 1]} : vector<16x96xf32> to vector<16x16xf32>
    %59 = vector.shape_cast %58 : vector<16x16xf32> to vector<2x8x16xf32>
    %60 = arith.truncf %55 : vector<2x8x16xf32> to vector<2x8x16xbf16>
    %61 = arith.truncf %57 : vector<2x8x16xf32> to vector<2x8x16xbf16>
    "tpu.trace_start"() <{level = 10 : i32, message = "bqd,bkd->bqk"}> : () -> ()
    %cst_25 = arith.constant dense<0.000000e+00> : vector<2x8x8xf32>
    %62 = tpu.matmul %60, %61, %cst_25 {dimension_numbers = #tpu.dot_dimension_numbers<[2], [2], [1], [1], [0, 0, 0, 1, 1, 1], [0], [0]>} : vector<2x8x16xbf16>, vector<2x8x16xbf16>, vector<2x8x8xf32> -> vector<2x8x8xf32>
    "tpu.trace_stop"() : () -> ()
    %cst_26 = arith.constant 2.500000e-01 : f32
    %63 = vector.broadcast %cst_26 : f32 to vector<2x8x8xf32>
    %64 = arith.mulf %62, %63 : vector<2x8x8xf32>
    %65 = arith.addf %64, %6 : vector<2x8x8xf32>
    %cst_27 = arith.constant dense<0xFF800000> : vector<2x8xf32>
    %66 = vector.multi_reduction <maximumf>, %65, %cst_27 [2] : vector<2x8x8xf32> to vector<2x8xf32>
    %67 = vector.shape_cast %66 : vector<2x8xf32> to vector<2x8x1xf32>
    %68 = vector.broadcast %67 : vector<2x8x1xf32> to vector<2x8x8xf32>
    %69 = arith.subf %65, %68 : vector<2x8x8xf32>
    %70 = math.exp %69 : vector<2x8x8xf32>
    %cst_28 = arith.constant dense<0.000000e+00> : vector<2x8xf32>
    %71 = vector.multi_reduction <add>, %70, %cst_28 [2] : vector<2x8x8xf32> to vector<2x8xf32>
    %72 = vector.shape_cast %71 : vector<2x8xf32> to vector<2x8x1xf32>
    %73 = tpu.reciprocal %72 {approx = true} : vector<2x8x1xf32> -> vector<2x8x1xf32>
    %74 = vector.broadcast %73 : vector<2x8x1xf32> to vector<2x8x8xf32>
    %75 = arith.mulf %70, %74 : vector<2x8x8xf32>
    %76 = arith.truncf %75 : vector<2x8x8xf32> to vector<2x8x8xbf16>
    %77 = arith.truncf %59 : vector<2x8x16xf32> to vector<2x8x16xbf16>
    "tpu.trace_start"() <{level = 10 : i32, message = "bqk,bkd->bqd"}> : () -> ()
    %cst_29 = arith.constant dense<0.000000e+00> : vector<2x8x16xf32>
    %78 = tpu.matmul %76, %77, %cst_29 {dimension_numbers = #tpu.dot_dimension_numbers<[2], [1], [1], [2], [0, 0, 0, 1, 1, 2], [0], [0]>} : vector<2x8x8xbf16>, vector<2x8x16xbf16>, vector<2x8x16xf32> -> vector<2x8x16xf32>
    "tpu.trace_stop"() : () -> ()
    %79 = vector.shape_cast %78 : vector<2x8x16xf32> to vector<16x16xf32>
    %80 = arith.truncf %79 : vector<16x16xf32> to vector<16x16xbf16>
    %81 = vector.extract_strided_slice %8 {offsets = [16, 0], sizes = [16, 32], strides = [1, 1]} : vector<32x32xbf16> to vector<16x32xbf16>
    %cst_30 = arith.constant dense<0.000000e+00> : vector<16x32xf32>
    %82 = tpu.matmul %80, %81, %cst_30 {dimension_numbers = #tpu.dot_dimension_numbers<[1], [0], [0], [1], [0, 0, 1, 1], [], []>} : vector<16x16xbf16>, vector<16x32xbf16>, vector<16x32xf32> -> vector<16x32xf32>
    %83 = arith.addf %53, %82 : vector<16x32xf32>
    %84 = arith.addf %2, %83 : vector<16x32xf32>
    %85 = vector.broadcast %13 : vector<1x32xf32> to vector<16x32xf32>
    %86 = arith.addf %84, %85 : vector<16x32xf32>
    %cst_31 = arith.constant dense<0.000000e+00> : vector<16xf32>
    %87 = vector.multi_reduction <add>, %86, %cst_31 [1] : vector<16x32xf32> to vector<16xf32>
    %88 = vector.shape_cast %87 : vector<16xf32> to vector<16x1xf32>
    %cst_32 = arith.constant 3.200000e+01 : f32
    %89 = vector.broadcast %cst_32 : f32 to vector<16x1xf32>
    %90 = arith.divf %88, %89 : vector<16x1xf32>
    %91 = vector.broadcast %90 : vector<16x1xf32> to vector<16x32xf32>
    %92 = arith.subf %86, %91 : vector<16x32xf32>
    %93 = arith.mulf %92, %92 : vector<16x32xf32>
    %cst_33 = arith.constant dense<0.000000e+00> : vector<16xf32>
    %94 = vector.multi_reduction <add>, %93, %cst_33 [1] : vector<16x32xf32> to vector<16xf32>
    %95 = vector.shape_cast %94 : vector<16xf32> to vector<16x1xf32>
    %cst_34 = arith.constant 3.200000e+01 : f32
    %96 = vector.broadcast %cst_34 : f32 to vector<16x1xf32>
    %97 = arith.divf %95, %96 : vector<16x1xf32>
    %98 = vector.broadcast %90 : vector<16x1xf32> to vector<16x32xf32>
    %99 = arith.subf %86, %98 : vector<16x32xf32>
    %cst_35 = arith.constant 9.99999996E-13 : f32
    %100 = vector.broadcast %cst_35 : f32 to vector<16x1xf32>
    %101 = arith.addf %97, %100 : vector<16x1xf32>
    %102 = math.rsqrt %101 : vector<16x1xf32>
    %103 = vector.broadcast %102 : vector<16x1xf32> to vector<16x32xf32>
    %104 = arith.mulf %99, %103 : vector<16x32xf32>
    %105 = vector.broadcast %14 : vector<1x32xf32> to vector<16x32xf32>
    %106 = arith.mulf %104, %105 : vector<16x32xf32>
    %107 = vector.broadcast %15 : vector<1x32xf32> to vector<16x32xf32>
    %108 = arith.addf %106, %107 : vector<16x32xf32>
    %109 = arith.truncf %108 : vector<16x32xf32> to vector<16x32xbf16>
    %c0_36 = arith.constant 0 : index
    %c0_37 = arith.constant 0 : index
    %c0_38 = arith.constant 0 : index
    %c0_39 = arith.constant 0 : index
    %110 = vector.load %arg5[%c0_36, %c0_37, %c0_38, %c0_39] : memref<1x2x32x128xbf16, #tpu.memory_space<vmem>>, vector<1x1x32x128xbf16>
    %111 = vector.shape_cast %110 : vector<1x1x32x128xbf16> to vector<32x128xbf16>
    %cst_40 = arith.constant dense<0.000000e+00> : vector<16x128xf32>
    %112 = tpu.matmul %109, %111, %cst_40 {dimension_numbers = #tpu.dot_dimension_numbers<[1], [0], [0], [1], [0, 0, 1, 1], [], []>} : vector<16x32xbf16>, vector<32x128xbf16>, vector<16x128xf32> -> vector<16x128xf32>
    %113 = vector.broadcast %12 : vector<1x128xf32> to vector<16x128xf32>
    %114 = arith.addf %112, %113 : vector<16x128xf32>
    %cst_41 = arith.constant 5.000000e-01 : f32
    %115 = vector.broadcast %cst_41 : f32 to vector<16x128xf32>
    %116 = arith.mulf %115, %114 : vector<16x128xf32>
    %cst_42 = arith.constant 4.471500e-02 : f32
    %117 = vector.broadcast %cst_42 : f32 to vector<16x128xf32>
    %118 = arith.mulf %117, %114 : vector<16x128xf32>
    %119 = arith.mulf %118, %114 : vector<16x128xf32>
    %120 = arith.mulf %119, %114 : vector<16x128xf32>
    %121 = arith.addf %114, %120 : vector<16x128xf32>
    %cst_43 = arith.constant 0.797884583 : f32
    %122 = vector.broadcast %cst_43 : f32 to vector<16x128xf32>
    %123 = arith.mulf %122, %121 : vector<16x128xf32>
    %124 = math.tanh %123 : vector<16x128xf32>
    %cst_44 = arith.constant 1.000000e+00 : f32
    %125 = vector.broadcast %cst_44 : f32 to vector<16x128xf32>
    %126 = arith.addf %125, %124 : vector<16x128xf32>
    %127 = arith.mulf %116, %126 : vector<16x128xf32>
    %128 = arith.truncf %127 : vector<16x128xf32> to vector<16x128xbf16>
    %c0_45 = arith.constant 0 : index
    %c0_46 = arith.constant 0 : index
    %c0_47 = arith.constant 0 : index
    %c0_48 = arith.constant 0 : index
    %129 = vector.load %arg6[%c0_45, %c0_46, %c0_47, %c0_48] : memref<1x2x128x32xbf16, #tpu.memory_space<vmem>>, vector<1x1x128x32xbf16>
    %130 = vector.shape_cast %129 : vector<1x1x128x32xbf16> to vector<128x32xbf16>
    %cst_49 = arith.constant dense<0.000000e+00> : vector<16x32xf32>
    %131 = tpu.matmul %128, %130, %cst_49 {dimension_numbers = #tpu.dot_dimension_numbers<[1], [0], [0], [1], [0, 0, 1, 1], [], []>} : vector<16x128xbf16>, vector<128x32xbf16>, vector<16x32xf32> -> vector<16x32xf32>
    %132 = vector.broadcast %16 : vector<1x32xf32> to vector<16x32xf32>
    %133 = arith.addf %131, %132 : vector<16x32xf32>
    %134 = arith.addf %108, %133 : vector<16x32xf32>
    %cst_50 = arith.constant dense<0.000000e+00> : vector<16xf32>
    %135 = vector.multi_reduction <add>, %134, %cst_50 [1] : vector<16x32xf32> to vector<16xf32>
    %136 = vector.shape_cast %135 : vector<16xf32> to vector<16x1xf32>
    %cst_51 = arith.constant 3.200000e+01 : f32
    %137 = vector.broadcast %cst_51 : f32 to vector<16x1xf32>
    %138 = arith.divf %136, %137 : vector<16x1xf32>
    %139 = vector.broadcast %138 : vector<16x1xf32> to vector<16x32xf32>
    %140 = arith.subf %134, %139 : vector<16x32xf32>
    %141 = arith.mulf %140, %140 : vector<16x32xf32>
    %cst_52 = arith.constant dense<0.000000e+00> : vector<16xf32>
    %142 = vector.multi_reduction <add>, %141, %cst_52 [1] : vector<16x32xf32> to vector<16xf32>
    %143 = vector.shape_cast %142 : vector<16xf32> to vector<16x1xf32>
    %cst_53 = arith.constant 3.200000e+01 : f32
    %144 = vector.broadcast %cst_53 : f32 to vector<16x1xf32>
    %145 = arith.divf %143, %144 : vector<16x1xf32>
    %146 = vector.broadcast %138 : vector<16x1xf32> to vector<16x32xf32>
    %147 = arith.subf %134, %146 : vector<16x32xf32>
    %cst_54 = arith.constant 9.99999996E-13 : f32
    %148 = vector.broadcast %cst_54 : f32 to vector<16x1xf32>
    %149 = arith.addf %145, %148 : vector<16x1xf32>
    %150 = math.rsqrt %149 : vector<16x1xf32>
    %151 = vector.broadcast %150 : vector<16x1xf32> to vector<16x32xf32>
    %152 = arith.mulf %147, %151 : vector<16x32xf32>
    %153 = vector.broadcast %17 : vector<1x32xf32> to vector<16x32xf32>
    %154 = arith.mulf %152, %153 : vector<16x32xf32>
    %155 = vector.broadcast %18 : vector<1x32xf32> to vector<16x32xf32>
    %156 = arith.addf %154, %155 : vector<16x32xf32>
    %c0_55 = arith.constant 0 : index
    %c1 = arith.constant 1 : index
    %c0_56 = arith.constant 0 : index
    %c0_57 = arith.constant 0 : index
    %157 = vector.load %arg4[%c0_55, %c1, %c0_56, %c0_57] : memref<1x2x32x32xbf16, #tpu.memory_space<vmem>>, vector<1x1x32x32xbf16>
    %158 = vector.shape_cast %157 : vector<1x1x32x32xbf16> to vector<32x32xbf16>
    %c0_58 = arith.constant 0 : index
    %c1_59 = arith.constant 1 : index
    %c0_60 = arith.constant 0 : index
    %c0_61 = arith.constant 0 : index
    %159 = vector.load %arg7[%c0_58, %c1_59, %c0_60, %c0_61] : memref<1x2x8x128xf32, #tpu.memory_space<vmem>>, vector<1x1x8x128xf32>
    %160 = vector.shape_cast %159 : vector<1x1x8x128xf32> to vector<8x128xf32>
    %161 = vector.extract_strided_slice %160 {offsets = [0, 0], sizes = [1, 96], strides = [1, 1]} : vector<8x128xf32> to vector<1x96xf32>
    %162 = vector.extract_strided_slice %160 {offsets = [1, 0], sizes = [1, 128], strides = [1, 1]} : vector<8x128xf32> to vector<1x128xf32>
    %163 = vector.extract_strided_slice %160 {offsets = [2, 0], sizes = [1, 32], strides = [1, 1]} : vector<8x128xf32> to vector<1x32xf32>
    %164 = vector.extract_strided_slice %160 {offsets = [3, 0], sizes = [1, 32], strides = [1, 1]} : vector<8x128xf32> to vector<1x32xf32>
    %165 = vector.extract_strided_slice %160 {offsets = [4, 0], sizes = [1, 32], strides = [1, 1]} : vector<8x128xf32> to vector<1x32xf32>
    %166 = vector.extract_strided_slice %160 {offsets = [5, 0], sizes = [1, 32], strides = [1, 1]} : vector<8x128xf32> to vector<1x32xf32>
    %167 = vector.extract_strided_slice %160 {offsets = [6, 0], sizes = [1, 32], strides = [1, 1]} : vector<8x128xf32> to vector<1x32xf32>
    %168 = vector.extract_strided_slice %160 {offsets = [7, 0], sizes = [1, 32], strides = [1, 1]} : vector<8x128xf32> to vector<1x32xf32>
    %169 = arith.truncf %156 : vector<16x32xf32> to vector<16x32xbf16>
    %c0_62 = arith.constant 0 : index
    %c1_63 = arith.constant 1 : index
    %c0_64 = arith.constant 0 : index
    %c0_65 = arith.constant 0 : index
    %170 = vector.load %arg3[%c0_62, %c1_63, %c0_64, %c0_65] : memref<1x2x32x96xbf16, #tpu.memory_space<vmem>>, vector<1x1x32x96xbf16>
    %171 = vector.shape_cast %170 : vector<1x1x32x96xbf16> to vector<32x96xbf16>
    %cst_66 = arith.constant dense<0.000000e+00> : vector<16x96xf32>
    %172 = tpu.matmul %169, %171, %cst_66 {dimension_numbers = #tpu.dot_dimension_numbers<[1], [0], [0], [1], [0, 0, 1, 1], [], []>} : vector<16x32xbf16>, vector<32x96xbf16>, vector<16x96xf32> -> vector<16x96xf32>
    %173 = vector.broadcast %161 : vector<1x96xf32> to vector<16x96xf32>
    %174 = arith.addf %172, %173 : vector<16x96xf32>
    %175 = vector.extract_strided_slice %174 {offsets = [0, 0], sizes = [16, 16], strides = [1, 1]} : vector<16x96xf32> to vector<16x16xf32>
    %176 = vector.shape_cast %175 : vector<16x16xf32> to vector<2x8x16xf32>
    %177 = vector.extract_strided_slice %174 {offsets = [0, 32], sizes = [16, 16], strides = [1, 1]} : vector<16x96xf32> to vector<16x16xf32>
    %178 = vector.shape_cast %177 : vector<16x16xf32> to vector<2x8x16xf32>
    %179 = vector.extract_strided_slice %174 {offsets = [0, 64], sizes = [16, 16], strides = [1, 1]} : vector<16x96xf32> to vector<16x16xf32>
    %180 = vector.shape_cast %179 : vector<16x16xf32> to vector<2x8x16xf32>
    %181 = arith.truncf %176 : vector<2x8x16xf32> to vector<2x8x16xbf16>
    %182 = arith.truncf %178 : vector<2x8x16xf32> to vector<2x8x16xbf16>
    "tpu.trace_start"() <{level = 10 : i32, message = "bqd,bkd->bqk"}> : () -> ()
    %cst_67 = arith.constant dense<0.000000e+00> : vector<2x8x8xf32>
    %183 = tpu.matmul %181, %182, %cst_67 {dimension_numbers = #tpu.dot_dimension_numbers<[2], [2], [1], [1], [0, 0, 0, 1, 1, 1], [0], [0]>} : vector<2x8x16xbf16>, vector<2x8x16xbf16>, vector<2x8x8xf32> -> vector<2x8x8xf32>
    "tpu.trace_stop"() : () -> ()
    %cst_68 = arith.constant 2.500000e-01 : f32
    %184 = vector.broadcast %cst_68 : f32 to vector<2x8x8xf32>
    %185 = arith.mulf %183, %184 : vector<2x8x8xf32>
    %186 = arith.addf %185, %6 : vector<2x8x8xf32>
    %cst_69 = arith.constant dense<0xFF800000> : vector<2x8xf32>
    %187 = vector.multi_reduction <maximumf>, %186, %cst_69 [2] : vector<2x8x8xf32> to vector<2x8xf32>
    %188 = vector.shape_cast %187 : vector<2x8xf32> to vector<2x8x1xf32>
    %189 = vector.broadcast %188 : vector<2x8x1xf32> to vector<2x8x8xf32>
    %190 = arith.subf %186, %189 : vector<2x8x8xf32>
    %191 = math.exp %190 : vector<2x8x8xf32>
    %cst_70 = arith.constant dense<0.000000e+00> : vector<2x8xf32>
    %192 = vector.multi_reduction <add>, %191, %cst_70 [2] : vector<2x8x8xf32> to vector<2x8xf32>
    %193 = vector.shape_cast %192 : vector<2x8xf32> to vector<2x8x1xf32>
    %194 = tpu.reciprocal %193 {approx = true} : vector<2x8x1xf32> -> vector<2x8x1xf32>
    %195 = vector.broadcast %194 : vector<2x8x1xf32> to vector<2x8x8xf32>
    %196 = arith.mulf %191, %195 : vector<2x8x8xf32>
    %197 = arith.truncf %196 : vector<2x8x8xf32> to vector<2x8x8xbf16>
    %198 = arith.truncf %180 : vector<2x8x16xf32> to vector<2x8x16xbf16>
    "tpu.trace_start"() <{level = 10 : i32, message = "bqk,bkd->bqd"}> : () -> ()
    %cst_71 = arith.constant dense<0.000000e+00> : vector<2x8x16xf32>
    %199 = tpu.matmul %197, %198, %cst_71 {dimension_numbers = #tpu.dot_dimension_numbers<[2], [1], [1], [2], [0, 0, 0, 1, 1, 2], [0], [0]>} : vector<2x8x8xbf16>, vector<2x8x16xbf16>, vector<2x8x16xf32> -> vector<2x8x16xf32>
    "tpu.trace_stop"() : () -> ()
    %200 = vector.shape_cast %199 : vector<2x8x16xf32> to vector<16x16xf32>
    %201 = arith.truncf %200 : vector<16x16xf32> to vector<16x16xbf16>
    %202 = vector.extract_strided_slice %158 {offsets = [0, 0], sizes = [16, 32], strides = [1, 1]} : vector<32x32xbf16> to vector<16x32xbf16>
    %cst_72 = arith.constant dense<0.000000e+00> : vector<16x32xf32>
    %203 = tpu.matmul %201, %202, %cst_72 {dimension_numbers = #tpu.dot_dimension_numbers<[1], [0], [0], [1], [0, 0, 1, 1], [], []>} : vector<16x16xbf16>, vector<16x32xbf16>, vector<16x32xf32> -> vector<16x32xf32>
    %204 = vector.extract_strided_slice %174 {offsets = [0, 16], sizes = [16, 16], strides = [1, 1]} : vector<16x96xf32> to vector<16x16xf32>
    %205 = vector.shape_cast %204 : vector<16x16xf32> to vector<2x8x16xf32>
    %206 = vector.extract_strided_slice %174 {offsets = [0, 48], sizes = [16, 16], strides = [1, 1]} : vector<16x96xf32> to vector<16x16xf32>
    %207 = vector.shape_cast %206 : vector<16x16xf32> to vector<2x8x16xf32>
    %208 = vector.extract_strided_slice %174 {offsets = [0, 80], sizes = [16, 16], strides = [1, 1]} : vector<16x96xf32> to vector<16x16xf32>
    %209 = vector.shape_cast %208 : vector<16x16xf32> to vector<2x8x16xf32>
    %210 = arith.truncf %205 : vector<2x8x16xf32> to vector<2x8x16xbf16>
    %211 = arith.truncf %207 : vector<2x8x16xf32> to vector<2x8x16xbf16>
    "tpu.trace_start"() <{level = 10 : i32, message = "bqd,bkd->bqk"}> : () -> ()
    %cst_73 = arith.constant dense<0.000000e+00> : vector<2x8x8xf32>
    %212 = tpu.matmul %210, %211, %cst_73 {dimension_numbers = #tpu.dot_dimension_numbers<[2], [2], [1], [1], [0, 0, 0, 1, 1, 1], [0], [0]>} : vector<2x8x16xbf16>, vector<2x8x16xbf16>, vector<2x8x8xf32> -> vector<2x8x8xf32>
    "tpu.trace_stop"() : () -> ()
    %cst_74 = arith.constant 2.500000e-01 : f32
    %213 = vector.broadcast %cst_74 : f32 to vector<2x8x8xf32>
    %214 = arith.mulf %212, %213 : vector<2x8x8xf32>
    %215 = arith.addf %214, %6 : vector<2x8x8xf32>
    %cst_75 = arith.constant dense<0xFF800000> : vector<2x8xf32>
    %216 = vector.multi_reduction <maximumf>, %215, %cst_75 [2] : vector<2x8x8xf32> to vector<2x8xf32>
    %217 = vector.shape_cast %216 : vector<2x8xf32> to vector<2x8x1xf32>
    %218 = vector.broadcast %217 : vector<2x8x1xf32> to vector<2x8x8xf32>
    %219 = arith.subf %215, %218 : vector<2x8x8xf32>
    %220 = math.exp %219 : vector<2x8x8xf32>
    %cst_76 = arith.constant dense<0.000000e+00> : vector<2x8xf32>
    %221 = vector.multi_reduction <add>, %220, %cst_76 [2] : vector<2x8x8xf32> to vector<2x8xf32>
    %222 = vector.shape_cast %221 : vector<2x8xf32> to vector<2x8x1xf32>
    %223 = tpu.reciprocal %222 {approx = true} : vector<2x8x1xf32> -> vector<2x8x1xf32>
    %224 = vector.broadcast %223 : vector<2x8x1xf32> to vector<2x8x8xf32>
    %225 = arith.mulf %220, %224 : vector<2x8x8xf32>
    %226 = arith.truncf %225 : vector<2x8x8xf32> to vector<2x8x8xbf16>
    %227 = arith.truncf %209 : vector<2x8x16xf32> to vector<2x8x16xbf16>
    "tpu.trace_start"() <{level = 10 : i32, message = "bqk,bkd->bqd"}> : () -> ()
    %cst_77 = arith.constant dense<0.000000e+00> : vector<2x8x16xf32>
    %228 = tpu.matmul %226, %227, %cst_77 {dimension_numbers = #tpu.dot_dimension_numbers<[2], [1], [1], [2], [0, 0, 0, 1, 1, 2], [0], [0]>} : vector<2x8x8xbf16>, vector<2x8x16xbf16>, vector<2x8x16xf32> -> vector<2x8x16xf32>
    "tpu.trace_stop"() : () -> ()
    %229 = vector.shape_cast %228 : vector<2x8x16xf32> to vector<16x16xf32>
    %230 = arith.truncf %229 : vector<16x16xf32> to vector<16x16xbf16>
    %231 = vector.extract_strided_slice %158 {offsets = [16, 0], sizes = [16, 32], strides = [1, 1]} : vector<32x32xbf16> to vector<16x32xbf16>
    %cst_78 = arith.constant dense<0.000000e+00> : vector<16x32xf32>
    %232 = tpu.matmul %230, %231, %cst_78 {dimension_numbers = #tpu.dot_dimension_numbers<[1], [0], [0], [1], [0, 0, 1, 1], [], []>} : vector<16x16xbf16>, vector<16x32xbf16>, vector<16x32xf32> -> vector<16x32xf32>
    %233 = arith.addf %203, %232 : vector<16x32xf32>
    %234 = arith.addf %156, %233 : vector<16x32xf32>
    %235 = vector.broadcast %163 : vector<1x32xf32> to vector<16x32xf32>
    %236 = arith.addf %234, %235 : vector<16x32xf32>
    %cst_79 = arith.constant dense<0.000000e+00> : vector<16xf32>
    %237 = vector.multi_reduction <add>, %236, %cst_79 [1] : vector<16x32xf32> to vector<16xf32>
    %238 = vector.shape_cast %237 : vector<16xf32> to vector<16x1xf32>
    %cst_80 = arith.constant 3.200000e+01 : f32
    %239 = vector.broadcast %cst_80 : f32 to vector<16x1xf32>
    %240 = arith.divf %238, %239 : vector<16x1xf32>
    %241 = vector.broadcast %240 : vector<16x1xf32> to vector<16x32xf32>
    %242 = arith.subf %236, %241 : vector<16x32xf32>
    %243 = arith.mulf %242, %242 : vector<16x32xf32>
    %cst_81 = arith.constant dense<0.000000e+00> : vector<16xf32>
    %244 = vector.multi_reduction <add>, %243, %cst_81 [1] : vector<16x32xf32> to vector<16xf32>
    %245 = vector.shape_cast %244 : vector<16xf32> to vector<16x1xf32>
    %cst_82 = arith.constant 3.200000e+01 : f32
    %246 = vector.broadcast %cst_82 : f32 to vector<16x1xf32>
    %247 = arith.divf %245, %246 : vector<16x1xf32>
    %248 = vector.broadcast %240 : vector<16x1xf32> to vector<16x32xf32>
    %249 = arith.subf %236, %248 : vector<16x32xf32>
    %cst_83 = arith.constant 9.99999996E-13 : f32
    %250 = vector.broadcast %cst_83 : f32 to vector<16x1xf32>
    %251 = arith.addf %247, %250 : vector<16x1xf32>
    %252 = math.rsqrt %251 : vector<16x1xf32>
    %253 = vector.broadcast %252 : vector<16x1xf32> to vector<16x32xf32>
    %254 = arith.mulf %249, %253 : vector<16x32xf32>
    %255 = vector.broadcast %164 : vector<1x32xf32> to vector<16x32xf32>
    %256 = arith.mulf %254, %255 : vector<16x32xf32>
    %257 = vector.broadcast %165 : vector<1x32xf32> to vector<16x32xf32>
    %258 = arith.addf %256, %257 : vector<16x32xf32>
    %259 = arith.truncf %258 : vector<16x32xf32> to vector<16x32xbf16>
    %c0_84 = arith.constant 0 : index
    %c1_85 = arith.constant 1 : index
    %c0_86 = arith.constant 0 : index
    %c0_87 = arith.constant 0 : index
    %260 = vector.load %arg5[%c0_84, %c1_85, %c0_86, %c0_87] : memref<1x2x32x128xbf16, #tpu.memory_space<vmem>>, vector<1x1x32x128xbf16>
    %261 = vector.shape_cast %260 : vector<1x1x32x128xbf16> to vector<32x128xbf16>
    %cst_88 = arith.constant dense<0.000000e+00> : vector<16x128xf32>
    %262 = tpu.matmul %259, %261, %cst_88 {dimension_numbers = #tpu.dot_dimension_numbers<[1], [0], [0], [1], [0, 0, 1, 1], [], []>} : vector<16x32xbf16>, vector<32x128xbf16>, vector<16x128xf32> -> vector<16x128xf32>
    %263 = vector.broadcast %162 : vector<1x128xf32> to vector<16x128xf32>
    %264 = arith.addf %262, %263 : vector<16x128xf32>
    %cst_89 = arith.constant 5.000000e-01 : f32
    %265 = vector.broadcast %cst_89 : f32 to vector<16x128xf32>
    %266 = arith.mulf %265, %264 : vector<16x128xf32>
    %cst_90 = arith.constant 4.471500e-02 : f32
    %267 = vector.broadcast %cst_90 : f32 to vector<16x128xf32>
    %268 = arith.mulf %267, %264 : vector<16x128xf32>
    %269 = arith.mulf %268, %264 : vector<16x128xf32>
    %270 = arith.mulf %269, %264 : vector<16x128xf32>
    %271 = arith.addf %264, %270 : vector<16x128xf32>
    %cst_91 = arith.constant 0.797884583 : f32
    %272 = vector.broadcast %cst_91 : f32 to vector<16x128xf32>
    %273 = arith.mulf %272, %271 : vector<16x128xf32>
    %274 = math.tanh %273 : vector<16x128xf32>
    %cst_92 = arith.constant 1.000000e+00 : f32
    %275 = vector.broadcast %cst_92 : f32 to vector<16x128xf32>
    %276 = arith.addf %275, %274 : vector<16x128xf32>
    %277 = arith.mulf %266, %276 : vector<16x128xf32>
    %278 = arith.truncf %277 : vector<16x128xf32> to vector<16x128xbf16>
    %c0_93 = arith.constant 0 : index
    %c1_94 = arith.constant 1 : index
    %c0_95 = arith.constant 0 : index
    %c0_96 = arith.constant 0 : index
    %279 = vector.load %arg6[%c0_93, %c1_94, %c0_95, %c0_96] : memref<1x2x128x32xbf16, #tpu.memory_space<vmem>>, vector<1x1x128x32xbf16>
    %280 = vector.shape_cast %279 : vector<1x1x128x32xbf16> to vector<128x32xbf16>
    %cst_97 = arith.constant dense<0.000000e+00> : vector<16x32xf32>
    %281 = tpu.matmul %278, %280, %cst_97 {dimension_numbers = #tpu.dot_dimension_numbers<[1], [0], [0], [1], [0, 0, 1, 1], [], []>} : vector<16x128xbf16>, vector<128x32xbf16>, vector<16x32xf32> -> vector<16x32xf32>
    %282 = vector.broadcast %166 : vector<1x32xf32> to vector<16x32xf32>
    %283 = arith.addf %281, %282 : vector<16x32xf32>
    %284 = arith.addf %258, %283 : vector<16x32xf32>
    %cst_98 = arith.constant dense<0.000000e+00> : vector<16xf32>
    %285 = vector.multi_reduction <add>, %284, %cst_98 [1] : vector<16x32xf32> to vector<16xf32>
    %286 = vector.shape_cast %285 : vector<16xf32> to vector<16x1xf32>
    %cst_99 = arith.constant 3.200000e+01 : f32
    %287 = vector.broadcast %cst_99 : f32 to vector<16x1xf32>
    %288 = arith.divf %286, %287 : vector<16x1xf32>
    %289 = vector.broadcast %288 : vector<16x1xf32> to vector<16x32xf32>
    %290 = arith.subf %284, %289 : vector<16x32xf32>
    %291 = arith.mulf %290, %290 : vector<16x32xf32>
    %cst_100 = arith.constant dense<0.000000e+00> : vector<16xf32>
    %292 = vector.multi_reduction <add>, %291, %cst_100 [1] : vector<16x32xf32> to vector<16xf32>
    %293 = vector.shape_cast %292 : vector<16xf32> to vector<16x1xf32>
    %cst_101 = arith.constant 3.200000e+01 : f32
    %294 = vector.broadcast %cst_101 : f32 to vector<16x1xf32>
    %295 = arith.divf %293, %294 : vector<16x1xf32>
    %296 = vector.broadcast %288 : vector<16x1xf32> to vector<16x32xf32>
    %297 = arith.subf %284, %296 : vector<16x32xf32>
    %cst_102 = arith.constant 9.99999996E-13 : f32
    %298 = vector.broadcast %cst_102 : f32 to vector<16x1xf32>
    %299 = arith.addf %295, %298 : vector<16x1xf32>
    %300 = math.rsqrt %299 : vector<16x1xf32>
    %301 = vector.broadcast %300 : vector<16x1xf32> to vector<16x32xf32>
    %302 = arith.mulf %297, %301 : vector<16x32xf32>
    %303 = vector.broadcast %167 : vector<1x32xf32> to vector<16x32xf32>
    %304 = arith.mulf %302, %303 : vector<16x32xf32>
    %305 = vector.broadcast %168 : vector<1x32xf32> to vector<16x32xf32>
    %306 = arith.addf %304, %305 : vector<16x32xf32>
    %307 = vector.shape_cast %306 : vector<16x32xf32> to vector<2x8x32xf32>
    %308 = vector.extract_strided_slice %307 {offsets = [0, 0, 0], sizes = [2, 1, 32], strides = [1, 1, 1]} : vector<2x8x32xf32> to vector<2x1x32xf32>
    %309 = vector.shape_cast %308 : vector<2x1x32xf32> to vector<2x32xf32>
    %c0_103 = arith.constant 0 : index
    %c0_104 = arith.constant 0 : index
    %c0_105 = arith.constant 0 : index
    %310 = vector.load %arg8[%c0_103, %c0_104, %c0_105] : memref<1x2x32xf32, #tpu.memory_space<vmem>>, vector<1x2x32xf32>
    %311 = vector.shape_cast %310 : vector<1x2x32xf32> to vector<2x32xf32>
    %312 = vector.shape_cast %309 : vector<2x32xf32> to vector<1x2x32xf32>
    tpu.vector_store %arg8[%c0_103, %c0_104, %c0_105], %312 {strides = array<i32>} : memref<1x2x32xf32, #tpu.memory_space<vmem>>, vector<1x2x32xf32>,
    return
  }
  func.func @transform_0(%arg0: i32) -> (i32, i32, i32, i32) {
    %c0_i32 = arith.constant 0 : i32
    %c0_i32_0 = arith.constant 0 : i32
    %c0_i32_1 = arith.constant 0 : i32
    %c0_i32_2 = arith.constant 0 : i32
    return %arg0, %c0_i32, %c0_i32_0, %c0_i32_1 : i32, i32, i32, i32
  }
  func.func @transform_1(%arg0: i32) -> (i32, i32, i32, i32) {
    %c0_i32 = arith.constant 0 : i32
    %c0_i32_0 = arith.constant 0 : i32
    %c0_i32_1 = arith.constant 0 : i32
    %c0_i32_2 = arith.constant 0 : i32
    return %arg0, %c0_i32, %c0_i32_0, %c0_i32_1 : i32, i32, i32, i32
  }
  func.func @transform_2(%arg0: i32) -> (i32, i32, i32, i32) {
    %c0_i32 = arith.constant 0 : i32
    %c0_i32_0 = arith.constant 0 : i32
    %c0_i32_1 = arith.constant 0 : i32
    %c0_i32_2 = arith.constant 0 : i32
    return %arg0, %c0_i32, %c0_i32_0, %c0_i32_1 : i32, i32, i32, i32
  }
  func.func @transform_3(%arg0: i32) -> (i32, i32, i32, i32) {
    %c0_i32 = arith.constant 0 : i32
    %c0_i32_0 = arith.constant 0 : i32
    %c0_i32_1 = arith.constant 0 : i32
    %c0_i32_2 = arith.constant 0 : i32
    return %arg0, %c0_i32, %c0_i32_0, %c0_i32_1 : i32, i32, i32, i32
  }
  func.func @transform_4(%arg0: i32) -> (i32, i32, i32, i32) {
    %c0_i32 = arith.constant 0 : i32
    %c0_i32_0 = arith.constant 0 : i32
    %c0_i32_1 = arith.constant 0 : i32
    %c0_i32_2 = arith.constant 0 : i32
    return %arg0, %c0_i32, %c0_i32_0, %c0_i32_1 : i32, i32, i32, i32
  }
  func.func @transform_5(%arg0: i32) -> (i32, i32, i32, i32) {
    %c0_i32 = arith.constant 0 : i32
    %c0_i32_0 = arith.constant 0 : i32
    %c0_i32_1 = arith.constant 0 : i32
    %c0_i32_2 = arith.constant 0 : i32
    return %arg0, %c0_i32, %c0_i32_0, %c0_i32_1 : i32, i32, i32, i32
  }
  func.func @transform_6(%arg0: i32) -> (i32, i32, i32, i32) {
    %c0_i32 = arith.constant 0 : i32
    %c0_i32_0 = arith.constant 0 : i32
    %c0_i32_1 = arith.constant 0 : i32
    %c0_i32_2 = arith.constant 0 : i32
    return %arg0, %c0_i32, %c0_i32_0, %c0_i32_1 : i32, i32, i32, i32
  }
  func.func @transform_7(%arg0: i32) -> (i32, i32, i32) {
    %c0_i32 = arith.constant 0 : i32
    %c0_i32_0 = arith.constant 0 : i32
    %c0_i32_1 = arith.constant 0 : i32
    return %arg0, %c0_i32, %c0_i32_0 : i32, i32, i32
  }
}

</mosaic_0001>

<bundles_post_ra>
// kernel: bi_encoder_product_forward.1
= control target key start
LH: loop header
LB: loop body
LE: loop exit
PB: predicated region body
PF: predicated region fallthrough
CT: control target
= control target key end

     0   :  { %s2030_s24 = smov 0   ;;  %s2299_s0 = inlined_call_operand.vmem [shape: f32[2,2,8,32], index: 0, kind: input, shape index: {}]   ;;  %s2300_s1 = inlined_call_operand.vmem [shape: f32[2,2,1,8], index: 1, kind: input, shape index: {}]   ;;  %s2301_s2 = inlined_call_operand.vmem [shape: bf16[2,2,32,96], index: 2, kind: input, shape index: {}]   ;;  %s2302_s3 = inlined_call_operand.vmem [shape: bf16[2,2,32,32], index: 3, kind: input, shape index: {}]   ;;  %s2303_s4 = inlined_call_operand.vmem [shape: bf16[2,2,32,128], index: 4, kind: input, shape index: {}]   ;;  %s2304_s5 = inlined_call_operand.vmem [shape: bf16[2,2,128,32], index: 5, kind: input, shape index: {}]   ;;  %s2305_s6 = inlined_call_operand.vmem [shape: f32[2,2,8,128], index: 6, kind: input, shape index: {}]   ;;  %s2306_s7 = inlined_call_operand.vmem [shape: f32[2,2,32], index: 7, kind: output, shape index: {}]  }
   0x1 LB: > { %s1682_s25 = sadd.s32 4294967295, %s1982_s24   ;;  %p1686_p0 = scmp.ge.s32.totalorder %s1982_s24, 1  ;;  %s1982_s24 = sphi %s2030_s24, %s17_s24  }
   0x2   : > { %p296_p1 = scmp.lt.s32.totalorder %s1982_s24, 3 }
   0x4   : > { %p297_p2 = pnand %p1686_p0, %p296_p1 }
   0x5   : > { %p356_p3 = scmp.lt.s32.totalorder (!%p297_p2), %s1682_s25, 1  ;;  %s1984_s14 = smov (!%p297_p2), 112  }
   0x6   : > { %300 = sbr.rel (%p297_p2) target bundleno = 3616 (0xe20), region = 48  ;;  %s1985_s15 = smov (!%p297_p2), 80  }
   0x7   : > { %s1986_s16 = smov (!%p297_p2), 96   ;;  %s1987_s21 = smov (!%p297_p2), 64  }
   0x8   : > { %s1988_s22 = smov (!%p297_p2), 48  }
   0xb   : > { %s2308_s25 = smov (!%p356_p3, %s1682_s25), 1  ;;  %vm428_vm0 = vcmask 261120   ;;  %vm453_vm1 = vcmask 130048   ;;  %vm501_vm2 = vcmask 64512   ;;  %vm531_vm3 = vcmask 1043456  }
   0xc   : > { %s2041_s26 = sshll.u32 %s2308_s25, 5  ;;  %s1868_s30 = sshll.u32 %s2308_s25, 4 }
   0xd   : > { %s2047_s29 = scalar_lea.vmem %s2301_s2, %s2041_s26  ;;  %s360_s10 = scalar_lea.vmem %s2299_s0, %s1868_s30 }
   0xe   : > { %v1877_v0 = vld [vmem:[%s2047_s29 + $0x8] sm:$0xff]  ;;  %v1876_v1 = vld [vmem:[%s2047_s29] sm:$0xff]  ;;  %s2065_s13 = scalar_lea.vmem %s2305_s6, %s1868_s30  ;;  %s1689_s17 = sshll.u32 %s2308_s25, 1 }
   0xf   : > { %438 = vmatpush.bf16.msra.mxu0 %v1877_v0  ;;  %v2055_v2 = vld [vmem:[%s360_s10] sm:$0xff]  ;;  %v2057_v3 = vld [vmem:[%s360_s10 + $0x8] sm:$0xff]  ;;  %s364_s20 = scalar_lea.vmem %s2300_s1, %s1689_s17  ;;  %s2137_s28 = scalar_lea.vmem %s2302_s3, %s2041_s26 }
  0x10   : > { %v410_v4 = vpack.c.bf16 %v2057_v3, %v2055_v2  ;;  %v2068_v5 = vld [vmem:[%s2065_s13] sm:$0xff]  ;;  %s2158_s9 = scalar_lea.vmem %s2303_s4, %s2041_s26  ;;  %s1872_s26 = sshll.u32 %s2308_s25, 7 }
  0x11   : > { %v415_v6 = vperm.slane %v2068_v5, 0  ;;  %v2101_v27 = vld [vmem:[%s364_s20] ss:$0 sm:$0xff]  ;;  %v2105_v33 = vld [vmem:[%s364_s20 + $0x1] ss:$0 sm:$0xff]  ;;  %s2171_s12 = scalar_lea.vmem %s2304_s5, %s1872_s26 }
  0x13   : > { %439 = vmatpush.bf16.msra.mxu0 %v1876_v1 }
  0x16   : > { %1709 = vmatmul.msk.bf16.vlgmr.msra.gmra.mxu0 %vm428_vm0, %v410_v4 }
  0x93   : > { %v441_v7 = vpop.f32.mrf.mxu0 }
  0x94   : > { %v442_v8 = vadd.f32 %v441_v7, %v415_v6 }
  0x96   : > { %v446_v9 = vpack.c.bf16 %v442_v8, %v442_v8 }
  0x98   : > { %v449_v10 = vunpack.c.l.b16 %v446_v9 }
  0x9a   : > { %v2071_v11 = vpack.c.b16 %v449_v10, %v449_v10 }
  0x9b   : > { %v443_v12 = vpop.f32.mrf.mxu0 }
  0x9c   : > { %v444_v13 = vadd.f32 %v443_v12, %v415_v6  ;;  %570 = vrot.lane.b32.xlu2 %v2071_v11, %s1984_s14  ;;  %572 = vrot.lane.b32.xlu1 %v2071_v11, %s1985_s15 }
  0x9d   : > { %451 = vrot.lane.b32.xlu0 %v2071_v11, %s1986_s16 }
  0x9e   : > { %v447_v14 = vpack.c.bf16 %v444_v13, %v444_v13 }
  0xa0   : > { %v474_v15 = vunpack.c.l.b16 %v447_v14 }
  0xa2   : > { %v2079_v16 = vpack.c.b16 %v474_v15, %v474_v15 }
  0xa4   : > { %593 = vrot.lane.b32.xlu2 %v2079_v16, %s1984_s14  ;;  %595 = vrot.lane.b32.xlu1 %v2079_v16, %s1985_s15 }
  0xa5   : > { %476 = vrot.lane.b32.xlu0 %v2079_v16, %s1986_s16 }
  0xf6   : > { %v571_v21 = vpop.permute.xlu2 %570 }
  0xfe   : > { %v594_v26 = vpop.permute.xlu2 %593 }
 0x10e   : > { %v573_v17 = vpop.permute.xlu1 %572 }
 0x10f   : > { %v452_v18 = vpop.permute.xlu0 %451  ;;  %v578_v19 = vsel %vm453_vm1, %v573_v17, 0 }
 0x110   : > { %v458_v20 = vsel %vm453_vm1, %v452_v18, 0  ;;  %587 = vmatpush.bf16.xpose.msrb.mxu0 %v578_v19 }
 0x111   : > { %467 = vmatpush.bf16.xpose.msra.mxu2 %v458_v20 }
 0x116   : > { %v596_v22 = vpop.permute.xlu1 %595 }
 0x117   : > { %v477_v23 = vpop.permute.xlu0 %476  ;;  %1714 = vmatmul.msk.bf16.vlgmr.msrb.gmra.mxu0 %vm453_vm1, %v571_v21  ;;  %v601_v24 = vsel %vm453_vm1, %v596_v22, 0 }
 0x118   : > { %1710 = vmatmul.msk.bf16.vlgmr.msra.gmra.mxu2 %vm453_vm1, %v446_v9  ;;  %v482_v25 = vsel %vm453_vm1, %v477_v23, 0  ;;  %610 = vmatpush.bf16.xpose.msra.mxu1 %v601_v24 }
 0x119   : > { %491 = vmatpush.bf16.xpose.msrb.mxu2 %v482_v25 }
 0x11f   : > { %1715 = vmatmul.msk.bf16.vlgmr.msra.gmra.mxu1 %vm453_vm1, %v594_v26 }
 0x128   : > { %1711 = vmatmul.msk.bf16.vlgmr.msrb.gmra.mxu2 %vm453_vm1, %v447_v14 }
 0x194   : > { %v589_v28 = vpop.f32.mrf.mxu0 }
 0x195   : > { %v616_v29 = vmul.f32 0.25, %v589_v28 }
 0x197   : > { %v618_v30 = vadd.f32 %v2101_v27, %v616_v29 }
 0x199   : > { %v620_v31 = vsel %vm501_vm2, %v618_v30, -inf }
 0x19a   : > { %621 = vmax.xlane.f32.xlu2 %v620_v31 }
 0x19b   : > { %v469_v32 = vpop.f32.mrf.mxu2 }
 0x19c   : > { %v497_v34 = vmul.f32 0.25, %v469_v32  ;;  %v591_v35 = vpop.f32.mrf.mxu0  ;;  %v612_v36 = vpop.f32.mrf.mxu1 }
 0x19d   : > { %v617_v37 = vmul.f32 0.25, %v612_v36  ;;  %v1875_v35 = vld [vmem:[%s2137_s28 + $0x8] sm:$0xff] }
 0x19e   : > { %v499_v38 = vadd.f32 %v2101_v27, %v497_v34  ;;  %v1874_v34 = vld [vmem:[%s2137_s28] sm:$0xff]  ;;  %703 = vmatpush.bf16.msra.mxu0 %v1875_v35  ;;  %v789_v35 = vperm.slane %v2068_v5, 3 }
 0x19f   : > { %v619_v39 = vadd.f32 %v2105_v33, %v617_v37  ;;  %726 = vmatpush.bf16.msrb.mxu1 %v1874_v34 }
 0x1a0   : > { %v502_v40 = vsel %vm501_vm2, %v499_v38, -inf }
 0x1a1   : > { %503 = vmax.xlane.f32.xlu0 %v502_v40  ;;  %v623_v41 = vsel %vm501_vm2, %v619_v39, -inf }
 0x1a2   : > { %624 = vmax.xlane.f32.xlu2 %v623_v41 }
 0x1a3   : > { %v471_v42 = vpop.f32.mrf.mxu2 }
 0x1a4   : > { %v614_v43 = vpop.f32.mrf.mxu1 }
 0x1ab   : > { %v493_v44 = vpop.f32.mrf.mxu2 }
 0x1ac   : > { %v498_v45 = vmul.f32 0.25, %v493_v44 }
 0x1ae   : > { %v500_v46 = vadd.f32 %v2105_v33, %v498_v45 }
 0x1b0   : > { %v505_v47 = vsel %vm501_vm2, %v500_v46, -inf }
 0x1b1   : > { %506 = vmax.xlane.f32.xlu1 %v505_v47 }
 0x1b3   : > { %v495_v48 = vpop.f32.mrf.mxu2 }
 0x1b5   : > { %548 = vrot.lane.b32.xlu0 %v2079_v16, %s1987_s21 }
 0x1ca   : > { %526 = vrot.lane.b32.xlu1 %v2071_v11, %s1987_s21 }
 0x1d2   : > { %644 = vrot.lane.b32.xlu1 %v2071_v11, %s1988_s22 }
 0x20d   : > { %v622_v54 = vpop.xlane.xlu2 %621 }
 0x20e   : > { %v626_v57 = vsub.f32 %v618_v30, %v622_v54 }
 0x210   : > { %v628_v59 = vmul.f32 1.442695, %v626_v57 }
 0x214   : > { %v504_v49 = vpop.xlane.xlu0 %503 }
 0x215   : > { %v508_v50 = vsub.f32 %v499_v38, %v504_v49  ;;  %v625_v60 = vpop.xlane.xlu2 %624  ;;  %v735_v49 = vperm.slane %v2068_v5, 2 }
 0x216   : > { %v627_v62 = vsub.f32 %v619_v39, %v625_v60 }
 0x217   : > { %v510_v51 = vmul.f32 1.442695, %v508_v50 }
 0x218   : > { %v630_v0 = vmul.f32 1.442695, %v627_v62 }
 0x219   : > { %1918 = vpow2.f32 %v510_v51 }
 0x21f   : > { %v1919_v52 = vpop.eup %1918 }
 0x220   : > { %v514_v53 = vsel %vm501_vm2, %v1919_v52, 0.0 }
 0x221   : > { %515 = vadd.xlane.f32.xlu0 %v514_v53 }
 0x224   : > { %v507_v55 = vpop.xlane.xlu1 %506 }
 0x225   : > { %v509_v56 = vsub.f32 %v500_v46, %v507_v55 }
 0x227   : > { %v512_v58 = vmul.f32 1.442695, %v509_v56  ;;  %v549_v6 = vpop.permute.xlu0 %548 }
 0x228   : > { %v554_v10 = vsel %vm531_vm3, %v549_v6, 0 }
 0x229   : > { %1920 = vpow2.f32 %v512_v58 }
 0x22a   : > { %1922 = vpow2.f32 %v628_v59  ;;  %v1989_v59 = vmov 32.0  }
 0x22b   : > { %1924 = vpow2.f32 %v630_v0 }
 0x22f   : > { %v1921_v61 = vpop.eup %1920 }
 0x230   : > { %v517_v63 = vsel %vm501_vm2, %v1921_v61, 0.0  ;;  %v1923_v1 = vpop.eup %1922 }
 0x231   : > { %518 = vadd.xlane.f32.xlu2 %v517_v63  ;;  %v632_v4 = vsel %vm501_vm2, %v1923_v1, 0.0  ;;  %v1925_v8 = vpop.eup %1924 }
 0x232   : > { %v635_v11 = vsel %vm501_vm2, %v1925_v8, 0.0 }
 0x235   : > { %665 = vrot.lane.b32.xlu0 %v2079_v16, %s1988_s22 }
 0x239   : > { %633 = vadd.xlane.f32.xlu2 %v632_v4 }
 0x23c   : > { %v527_v7 = vpop.permute.xlu1 %526 }
 0x23d   : > { %v533_v9 = vsel %vm531_vm3, %v527_v7, 0 }
 0x23e   : > { %542 = vmatpush.bf16.msra.mxu3 %v533_v9 }
 0x241   : > { %636 = vadd.xlane.f32.xlu2 %v635_v11 }
 0x242   : > { %563 = vmatpush.bf16.msrb.mxu3 %v554_v10 }
 0x244   : > { %v645_v12 = vpop.permute.xlu1 %644 }
 0x245   : > { %v650_v13 = vsel %vm531_vm3, %v645_v12, 0 }
 0x246   : > { %659 = vmatpush.bf16.msra.mxu2 %v650_v13  ;;  %v1879_v13 = vld [vmem:[%s2158_s9 + $0x8] sm:$0xff] }
 0x24a   : > { %822 = vmatpush.bf16.msrb.mxu2 %v1879_v13 }
 0x294   : > { %v516_v14 = vpop.xlane.xlu0 %515 }
 0x295   : > { %1926 = vrcp.f32 %v516_v14 }
 0x29b   : > { %v1927_v15 = vpop.eup %1926 }
 0x29c   : > { %v522_v16 = vmul.f32 %v1927_v15, %v1919_v52 }
 0x29e   : > { %v524_v17 = vpack.c.bf16 %v522_v16, %v522_v16  ;;  %v1878_v16 = vld [vmem:[%s2158_s9] sm:$0xff] }
 0x29f   : > { %823 = vmatpush.bf16.msrb.mxu2 %v1878_v16  ;;  %v865_v16 = vperm.slane %v2068_v5, 5 }
 0x2a0   : > { %1712 = vmatmul.msk.bf16.vlgmr.msra.gmra.mxu3 %vm501_vm2, %v524_v17 }
 0x2a4   : > { %v519_v18 = vpop.xlane.xlu2 %518 }
 0x2a5   : > { %1928 = vrcp.f32 %v519_v18 }
 0x2a7   : > { %v666_v19 = vpop.permute.xlu0 %665 }
 0x2a8   : > { %v671_v20 = vsel %vm531_vm3, %v666_v19, 0 }
 0x2a9   : > { %680 = vmatpush.bf16.msra.mxu3 %v671_v20 }
 0x2ab   : > { %v1929_v21 = vpop.eup %1928 }
 0x2ac   : > { %v523_v22 = vmul.f32 %v1929_v21, %v1921_v61  ;;  %v634_v23 = vpop.xlane.xlu2 %633 }
 0x2ad   : > { %1930 = vrcp.f32 %v634_v23 }
 0x2ae   : > { %v525_v24 = vpack.c.bf16 %v523_v22, %v523_v22 }
 0x2b0   : > { %1713 = vmatmul.msk.bf16.vlgmr.msrb.gmra.mxu3 %vm501_vm2, %v525_v24 }
 0x2b3   : > { %v1931_v25 = vpop.eup %1930 }
 0x2b4   : > { %v640_v26 = vmul.f32 %v1931_v25, %v1923_v1  ;;  %v637_v28 = vpop.xlane.xlu2 %636 }
 0x2b5   : > { %1932 = vrcp.f32 %v637_v28 }
 0x2b6   : > { %v642_v29 = vpack.c.bf16 %v640_v26, %v640_v26  ;;  %1934 = vrcp.f32 %v1989_v59 }
 0x2b8   : > { %1716 = vmatmul.msk.bf16.vlgmr.msra.gmra.mxu2 %vm501_vm2, %v642_v29 }
 0x2bb   : > { %v1933_v30 = vpop.eup %1932 }
 0x2bc   : > { %v641_v31 = vmul.f32 %v1933_v30, %v1925_v8  ;;  %v1935_v60 = vpop.eup %1934 }
 0x2bd   : > { %v745_v61 = vmul.f32 32.0, %v1935_v60  ;;  %vm749_vm4 = vweird.f32 %v1935_v60 }
 0x2be   : > { %v643_v32 = vpack.c.bf16 %v641_v31, %v641_v31 }
 0x2bf   : > { %v746_v62 = vsub.f32 1.0, %v745_v61 }
 0x2c0   : > { %1717 = vmatmul.msk.bf16.vlgmr.msra.gmra.mxu3 %vm501_vm2, %v643_v32 }
 0x2c1   : > { %v747_v63 = vmul.f32 %v1935_v60, %v746_v62 }
 0x323   : > { %v544_v36 = vpop.f32.mrf.mxu3 }
 0x32b   : > { %v546_v37 = vpop.f32.mrf.mxu3 }
 0x333   : > { %v565_v38 = vpop.f32.mrf.mxu3 }
 0x334   : > { %v569_v39 = vpack.c.bf16 %v565_v38, %v544_v36 }
 0x336   : > { %1727 = vmatmul.msk.bf16.vlgmr.msrb.gmra.mxu1 %vm453_vm1, %v569_v39  ;;  %v792_v39 = vperm.slane %v2068_v5, 4 }
 0x33b   : > { %v567_v40 = vpop.f32.mrf.mxu3  ;;  %v661_v41 = vpop.f32.mrf.mxu2 }
 0x343   : > { %v663_v42 = vpop.f32.mrf.mxu2  ;;  %v682_v43 = vpop.f32.mrf.mxu3 }
 0x344   : > { %v686_v44 = vpack.c.bf16 %v682_v43, %v661_v41 }
 0x346   : > { %1722 = vmatmul.msk.bf16.vlgmr.msra.gmra.mxu0 %vm453_vm1, %v686_v44 }
 0x34b   : > { %v684_v45 = vpop.f32.mrf.mxu3 }
 0x3b3   : > { %v728_v46 = vpop.f32.mrf.mxu1 }
 0x3bb   : > { %v730_v53 = vpop.f32.mrf.mxu1 }
 0x3c3   : > { %v705_v47 = vpop.f32.mrf.mxu0 }
 0x3c4   : > { %v729_v48 = vadd.f32 %v728_v46, %v705_v47  ;;  %v1887_v46 = vld [vmem:[%s2171_s12 + $0x38] sm:$0xff]  ;;  %v1886_v47 = vld [vmem:[%s2171_s12 + $0x30] sm:$0xff] }
 0x3c5   : > { %914 = vmatpush.bf16.msrb.mxu3 %v1887_v46 }
 0x3c6   : > { %v733_v50 = vadd.f32 %v729_v48, %v2055_v2  ;;  %v748_v2 = vadd.f32 %v1935_v60, %v747_v63  ;;  %v1885_v48 = vld [vmem:[%s2171_s12 + $0x28] sm:$0xff] }
 0x3c8   : > { %v736_v51 = vadd.f32 %v735_v49, %v733_v50  ;;  %v2148_v0 = vsel %vm749_vm4, %v1935_v60, %v748_v2  ;;  %v1883_v50 = vld [vmem:[%s2171_s12 + $0x18] sm:$0xff] }
 0x3c9   : > { %915 = vmatpush.bf16.msrb.mxu3 %v1886_v47 }
 0x3ca   : > { %v738_v52 = vsel %vm428_vm0, %v736_v51, 0.0 }
 0x3cb   : > { %739 = vadd.xlane.f32.xlu2 %v738_v52  ;;  %v707_v54 = vpop.f32.mrf.mxu0  ;;  %v1881_v52 = vld [vmem:[%s2171_s12 + $0x8] sm:$0xff] }
 0x3cc   : > { %v731_v55 = vadd.f32 %v730_v53, %v707_v54  ;;  %v1880_v53 = vld [vmem:[%s2171_s12] sm:$0xff]  ;;  %v800_v54 = vperm.slane %v2068_v5, 1 }
 0x3cd   : > { %916 = vmatpush.bf16.msrb.mxu3 %v1885_v48 }
 0x3ce   : > { %v734_v56 = vadd.f32 %v731_v55, %v2057_v3 }
 0x3d0   : > { %v737_v57 = vadd.f32 %v735_v49, %v734_v56  ;;  %v1884_v49 = vld [vmem:[%s2171_s12 + $0x20] sm:$0xff] }
 0x3d1   : > { %917 = vmatpush.bf16.msrb.mxu3 %v1884_v49 }
 0x3d2   : > { %v741_v58 = vsel %vm428_vm0, %v737_v57, 0.0 }
 0x3d3   : > { %742 = vadd.xlane.f32.xlu1 %v741_v58 }
 0x3d5   : > { %918 = vmatpush.bf16.msrb.mxu3 %v1883_v50 }
 0x43e   : > { %v740_v1 = vpop.xlane.xlu2 %739 }
 0x43f   : > { %v751_v4 = vmul.f32 %v2148_v0, %v740_v1 }
 0x441   : > { %v753_v6 = vsub.f32 %v736_v51, %v751_v4  ;;  %v1882_v51 = vld [vmem:[%s2171_s12 + $0x10] sm:$0xff] }
 0x442   : > { %919 = vmatpush.bf16.msrb.mxu3 %v1882_v51 }
 0x443   : > { %v755_v3 = vmul.f32 %v753_v6, %v753_v6 }
 0x445   : > { %v757_v7 = vsel %vm428_vm0, %v755_v3, 0.0 }
 0x446   : > { %758 = vadd.xlane.f32.xlu0 %v757_v7  ;;  %v743_v8 = vpop.xlane.xlu1 %742  ;;  %920 = vmatpush.bf16.msrb.mxu3 %v1881_v52 }
 0x447   : > { %v752_v9 = vmul.f32 %v2148_v0, %v743_v8 }
 0x449   : > { %v754_v10 = vsub.f32 %v737_v57, %v752_v9 }
 0x44a   : > { %921 = vmatpush.bf16.msrb.mxu3 %v1880_v53 }
 0x44b   : > { %v756_v11 = vmul.f32 %v754_v10, %v754_v10 }
 0x44d   : > { %v760_v12 = vsel %vm428_vm0, %v756_v11, 0.0 }
 0x44e   : > { %761 = vadd.xlane.f32.xlu2 %v760_v12 }
 0x4b9   : > { %v759_v14 = vpop.xlane.xlu0 %758 }
 0x4ba   : > { %v763_v15 = vmul.f32 %v759_v14, %v2148_v0 }
 0x4bc   : > { %v765_v17 = vadd.f32 1e-12, %v763_v15 }
 0x4be   : > { %1936 = vrsqrt.f32 %v765_v17  ;;  %vm773_vm6 = vweird.f32 %v765_v17 }
 0x4c1   : > { %v762_v18 = vpop.xlane.xlu2 %761 }
 0x4c2   : > { %v764_v19 = vmul.f32 %v762_v18, %v2148_v0 }
 0x4c4   : > { %v1937_v20 = vpop.eup %1936  ;;  %v766_v21 = vadd.f32 1e-12, %v764_v19 }
 0x4c5   : > { %v768_v22 = vmul.f32 %v1937_v20, %v765_v17  ;;  %vm774_vm5 = vweird.f32 %v1937_v20 }
 0x4c6   : > { %1938 = vrsqrt.f32 %v766_v21  ;;  %vm775_vm7 = vmor %vm773_vm6, %vm774_vm5  ;;  %vm783_vm9 = vweird.f32 %v766_v21 }
 0x4c7   : > { %v769_v23 = vmul.f32 %v1937_v20, %v768_v22 }
 0x4c9   : > { %v770_v24 = vmul.f32 0.5, %v769_v23 }
 0x4cb   : > { %v771_v25 = vsub.f32 1.5, %v770_v24 }
 0x4cc   : > { %v1939_v26 = vpop.eup %1938 }
 0x4cd   : > { %v772_v28 = vmul.f32 %v1937_v20, %v771_v25  ;;  %v778_v29 = vmul.f32 %v1939_v26, %v766_v21  ;;  %vm784_vm8 = vweird.f32 %v1939_v26 }
 0x4ce   : > { %vm785_vm10 = vmor %vm783_vm9, %vm784_vm8 }
 0x4cf   : > { %v779_v30 = vmul.f32 %v1939_v26, %v778_v29  ;;  %v776_v31 = vsel %vm775_vm7, %v1937_v20, %v772_v28 }
 0x4d0   : > { %v787_v36 = vmul.f32 %v776_v31, %v753_v6 }
 0x4d1   : > { %v780_v32 = vmul.f32 0.5, %v779_v30 }
 0x4d2   : > { %v790_v40 = vmul.f32 %v789_v35, %v787_v36 }
 0x4d3   : > { %v781_v34 = vsub.f32 1.5, %v780_v32 }
 0x4d4   : > { %v793_v43 = vadd.f32 %v792_v39, %v790_v40  ;;  %v1890_v40 = vld [vmem:[%s2047_s29 + $0x10] sm:$0xff] }
 0x4d5   : > { %v782_v37 = vmul.f32 %v1939_v26, %v781_v34 }
 0x4d7   : > { %v786_v38 = vsel %vm785_vm10, %v1939_v26, %v782_v37  ;;  %v1891_v37 = vld [vmem:[%s2047_s29 + $0x18] sm:$0xff] }
 0x4d8   : > { %v788_v41 = vmul.f32 %v786_v38, %v754_v10  ;;  %1015 = vmatpush.bf16.msrb.mxu0 %v1891_v37 }
 0x4da   : > { %v791_v42 = vmul.f32 %v789_v35, %v788_v41 }
 0x4dc   : > { %v794_v44 = vadd.f32 %v792_v39, %v791_v42  ;;  %1016 = vmatpush.bf16.msrb.mxu0 %v1890_v40 }
 0x4de   : > { %v795_v45 = vpack.c.bf16 %v794_v44, %v793_v43 }
 0x4e0   : > { %1736 = vmatmul.msk.bf16.vlgmr.msrb.gmra.mxu2 %vm428_vm0, %v795_v45 }
 0x563   : > { %v825_v55 = vpop.f32.mrf.mxu2 }
 0x564   : > { %v826_v56 = vadd.f32 %v825_v55, %v800_v54 }
 0x566   : > { %v832_v57 = vmul.f32 0.044715, %v826_v56  ;;  %v830_v10 = vmul.f32 0.5, %v826_v56 }
 0x568   : > { %v834_v58 = vmul.f32 %v832_v57, %v826_v56  ;;  %v974_v57 = vperm.slane %v2068_v5, 6 }
 0x56a   : > { %v836_v59 = vmul.f32 %v834_v58, %v826_v56 }
 0x56b   : > { %v827_v60 = vpop.f32.mrf.mxu2 }
 0x56c   : > { %v838_v61 = vadd.f32 %v836_v59, %v826_v56  ;;  %v828_v62 = vadd.f32 %v827_v60, %v800_v54 }
 0x56e   : > { %v833_v63 = vmul.f32 0.044715, %v828_v62  ;;  %v840_v2 = vmul.f32 0.7978846, %v838_v61  ;;  %v831_v11 = vmul.f32 0.5, %v828_v62  ;;  %v977_v61 = vperm.slane %v2068_v5, 7 }
 0x570   : > { %v835_v1 = vmul.f32 %v833_v63, %v828_v62  ;;  %1940 = vtanh.f32 %v840_v2 }
 0x572   : > { %v837_v4 = vmul.f32 %v835_v1, %v828_v62 }
 0x574   : > { %v839_v6 = vadd.f32 %v837_v4, %v828_v62 }
 0x576   : > { %v841_v3 = vmul.f32 0.7978846, %v839_v6  ;;  %v1941_v7 = vpop.eup %1940 }
 0x577   : > { %v844_v8 = vadd.f32 1.0, %v1941_v7 }
 0x578   : > { %1942 = vtanh.f32 %v841_v3  ;;  %v2203_v3 = vld [vmem:[%s2065_s13 + $0x8] sm:$0xff] }
 0x579   : > { %v846_v13 = vmul.f32 %v844_v8, %v830_v10  ;;  %v993_v7 = vperm.slane %v2203_v3, 0 }
 0x57e   : > { %v1943_v9 = vpop.eup %1942 }
 0x57f   : > { %v845_v12 = vadd.f32 1.0, %v1943_v9 }
 0x581   : > { %v847_v14 = vmul.f32 %v845_v12, %v831_v11 }
 0x583   : > { %v848_v15 = vpack.c.bf16 %v847_v14, %v846_v13 }
 0x585   : > { %922 = vmatmul.bf16.vlgmr.msrb.gmra.mxu3 %v848_v15 }
 0x608   : > { %v923_v17 = vpop.f32.mrf.mxu3 }
 0x609   : > { %v924_v18 = vadd.f32 %v923_v17, %v865_v16 }
 0x60b   : > { %v928_v19 = vadd.f32 %v924_v18, %v793_v43 }
 0x60d   : > { %v930_v20 = vsel %vm428_vm0, %v928_v19, 0.0 }
 0x60e   : > { %931 = vadd.xlane.f32.xlu2 %v930_v20 }
 0x610   : > { %v925_v21 = vpop.f32.mrf.mxu3 }
 0x611   : > { %v926_v22 = vadd.f32 %v925_v21, %v865_v16 }
 0x613   : > { %v929_v23 = vadd.f32 %v926_v22, %v794_v44 }
 0x615   : > { %v933_v24 = vsel %vm428_vm0, %v929_v23, 0.0 }
 0x616   : > { %934 = vadd.xlane.f32.xlu2 %v933_v24 }
 0x681   : > { %v932_v25 = vpop.xlane.xlu2 %931 }
 0x682   : > { %v936_v26 = vmul.f32 %v932_v25, %v2148_v0 }
 0x684   : > { %v938_v28 = vsub.f32 %v928_v19, %v936_v26 }
 0x686   : > { %v940_v29 = vmul.f32 %v938_v28, %v938_v28 }
 0x688   : > { %v942_v30 = vsel %vm428_vm0, %v940_v29, 0.0 }
 0x689   : > { %943 = vadd.xlane.f32.xlu2 %v942_v30  ;;  %v935_v31 = vpop.xlane.xlu2 %934 }
 0x68a   : > { %v937_v32 = vmul.f32 %v935_v31, %v2148_v0 }
 0x68c   : > { %v939_v34 = vsub.f32 %v929_v23, %v937_v32 }
 0x68e   : > { %v941_v35 = vmul.f32 %v939_v34, %v939_v34 }
 0x690   : > { %v945_v36 = vsel %vm428_vm0, %v941_v35, 0.0 }
 0x691   : > { %946 = vadd.xlane.f32.xlu2 %v945_v36 }
 0x6fc   : > { %v944_v38 = vpop.xlane.xlu2 %943 }
 0x6fd   : > { %v948_v39 = vmul.f32 %v944_v38, %v2148_v0 }
 0x6ff   : > { %v950_v41 = vadd.f32 1e-12, %v948_v39 }
 0x701   : > { %1944 = vrsqrt.f32 %v950_v41  ;;  %vm958_vm12 = vweird.f32 %v950_v41 }
 0x704   : > { %v947_v42 = vpop.xlane.xlu2 %946 }
 0x705   : > { %v949_v43 = vmul.f32 %v947_v42, %v2148_v0 }
 0x707   : > { %v1945_v44 = vpop.eup %1944  ;;  %v951_v45 = vadd.f32 1e-12, %v949_v43 }
 0x708   : > { %v953_v46 = vmul.f32 %v1945_v44, %v950_v41  ;;  %vm959_vm11 = vweird.f32 %v1945_v44 }
 0x709   : > { %1946 = vrsqrt.f32 %v951_v45  ;;  %vm960_vm13 = vmor %vm958_vm12, %vm959_vm11  ;;  %vm968_vm15 = vweird.f32 %v951_v45 }
 0x70a   : > { %v954_v47 = vmul.f32 %v1945_v44, %v953_v46 }
 0x70c   : > { %v955_v48 = vmul.f32 0.5, %v954_v47 }
 0x70e   : > { %v956_v49 = vsub.f32 1.5, %v955_v48 }
 0x70f   : > { %v1947_v50 = vpop.eup %1946 }
 0x710   : > { %v957_v51 = vmul.f32 %v1945_v44, %v956_v49  ;;  %v963_v52 = vmul.f32 %v1947_v50, %v951_v45  ;;  %vm969_vm14 = vweird.f32 %v1947_v50 }
 0x711   : > { %vm970_vm4 = vmor %vm968_vm15, %vm969_vm14  ;;  %vm1555_vm14 = vcmask 254976  }
 0x712   : > { %v964_v53 = vmul.f32 %v1947_v50, %v963_v52  ;;  %v961_v54 = vsel %vm960_vm13, %v1945_v44, %v957_v51  ;;  %vm1552_vm13 = vcmask 1041409  }
 0x713   : > { %v972_v58 = vmul.f32 %v961_v54, %v938_v28 }
 0x714   : > { %v965_v55 = vmul.f32 0.5, %v964_v53 }
 0x715   : > { %v975_v62 = vmul.f32 %v974_v57, %v972_v58 }
 0x716   : > { %v966_v56 = vsub.f32 1.5, %v965_v55 }
 0x717   : > { %v2195_v1 = vadd.f32 %v977_v61, %v975_v62 }
 0x718   : > { %v967_v59 = vmul.f32 %v1947_v50, %v966_v56 }
 0x71a   : > { %v971_v60 = vsel %vm970_vm4, %v1947_v50, %v967_v59 }
 0x71b   : > { %v973_v63 = vmul.f32 %v971_v60, %v939_v34 }
 0x71d   : > { %v976_v2 = vmul.f32 %v974_v57, %v973_v63 }
 0x71f   : > { %v2197_v4 = vadd.f32 %v977_v61, %v976_v2 }
 0x721   : > { %v987_v6 = vpack.c.bf16 %v2197_v4, %v2195_v1 }
 0x723   : > { %1786 = vmatmul.msk.bf16.vlgmr.msrb.gmra.mxu0 %vm428_vm0, %v987_v6 }
 0x7a0   : > { %v1018_v8 = vpop.f32.mrf.mxu0 }
 0x7a1   : > { %v1019_v9 = vadd.f32 %v1018_v8, %v993_v7 }
 0x7a3   : > { %v1023_v10 = vpack.c.bf16 %v1019_v9, %v1019_v9 }
 0x7a5   : > { %v1026_v5 = vunpack.c.l.b16 %v1023_v10 }
 0x7a7   : > { %v1027_v11 = vpack.c.b16 %v1026_v5, %v1026_v5 }
 0x7a8   : > { %v1020_v12 = vpop.f32.mrf.mxu0 }
 0x7a9   : > { %v1021_v13 = vadd.f32 %v1020_v12, %v993_v7  ;;  %1146 = vrot.lane.b32.xlu2 %v1027_v11, %s1985_s15  ;;  %1028 = vrot.lane.b32.xlu0 %v1027_v11, %s1986_s16 }
 0x7ab   : > { %v1024_v14 = vpack.c.bf16 %v1021_v13, %v1021_v13 }
 0x7ad   : > { %v1050_v15 = vunpack.c.l.b16 %v1024_v14 }
 0x7af   : > { %v2208_v16 = vpack.c.b16 %v1050_v15, %v1050_v15 }
 0x7b1   : > { %1052 = vrot.lane.b32.xlu1 %v2208_v16, %s1986_s16  ;;  %1167 = vrot.lane.b32.xlu2 %v2208_v16, %s1984_s14 }
 0x7b2   : > { %1169 = vrot.lane.b32.xlu0 %v2208_v16, %s1985_s15 }
 0x7b9   : > { %1144 = vrot.lane.b32.xlu1 %v1027_v11, %s1984_s14  ;;  %s393_s14 = scalar_lea.vmem %s2306_s7, %s1689_s17 }
 0x803   : > { %v1147_v19 = vpop.permute.xlu2 %1146 }
 0x804   : > { %v1152_v23 = vsel %vm453_vm1, %v1147_v19, 0 }
 0x80b   : > { %v1168_v25 = vpop.permute.xlu2 %1167 }
 0x81b   : > { %v1029_v17 = vpop.permute.xlu0 %1028 }
 0x81c   : > { %v1034_v18 = vsel %vm453_vm1, %v1029_v17, 0 }
 0x81d   : > { %1043 = vmatpush.bf16.xpose.msra.mxu1 %v1034_v18 }
 0x823   : > { %v1053_v20 = vpop.permute.xlu1 %1052 }
 0x824   : > { %v1058_v21 = vsel %vm453_vm1, %v1053_v20, 0  ;;  %v1170_v22 = vpop.permute.xlu0 %1169  ;;  %1787 = vmatmul.msk.bf16.vlgmr.msra.gmra.mxu1 %vm453_vm1, %v1023_v10 }
 0x825   : > { %v1175_v24 = vsel %vm453_vm1, %v1170_v22, 0  ;;  %1067 = vmatpush.bf16.xpose.msra.mxu2 %v1058_v21 }
 0x826   : > { %1184 = vmatpush.bf16.xpose.msra.mxu3 %v1175_v24 }
 0x82b   : > { %v1145_v26 = vpop.permute.xlu1 %1144 }
 0x82c   : > { %1788 = vmatmul.msk.bf16.vlgmr.msra.gmra.mxu2 %vm453_vm1, %v1024_v14 }
 0x82d   : > { %1161 = vmatpush.bf16.xpose.msrb.mxu2 %v1152_v23  ;;  %1792 = vmatmul.msk.bf16.vlgmr.msra.gmra.mxu3 %vm453_vm1, %v1168_v25 }
 0x83c   : > { %1791 = vmatmul.msk.bf16.vlgmr.msrb.gmra.mxu2 %vm453_vm1, %v1145_v26 }
 0x8a1   : > { %v1045_v28 = vpop.f32.mrf.mxu1 }
 0x8a2   : > { %v1073_v29 = vmul.f32 0.25, %v1045_v28 }
 0x8a4   : > { %v1075_v30 = vadd.f32 %v2101_v27, %v1073_v29 }
 0x8a6   : > { %v1077_v31 = vsel %vm501_vm2, %v1075_v30, -inf }
 0x8a7   : > { %1078 = vmax.xlane.f32.xlu0 %v1077_v31 }
 0x8a9   : > { %v1047_v32 = vpop.f32.mrf.mxu1 }
 0x8aa   : > { %v1888_v32 = vld [vmem:[%s2137_s28 + $0x10] sm:$0xff] }
 0x8ab   : > { %1300 = vmatpush.bf16.msrb.mxu3 %v1888_v32 }
 0x8af   : > { %v1069_v34 = vpop.f32.mrf.mxu2 }
 0x8b0   : > { %v1074_v35 = vmul.f32 0.25, %v1069_v34  ;;  %v1186_v36 = vpop.f32.mrf.mxu3 }
 0x8b1   : > { %v1191_v37 = vmul.f32 0.25, %v1186_v36 }
 0x8b2   : > { %v1076_v38 = vadd.f32 %v2105_v33, %v1074_v35  ;;  %v1889_v35 = vld [vmem:[%s2137_s28 + $0x18] sm:$0xff] }
 0x8b3   : > { %v1193_v39 = vadd.f32 %v2105_v33, %v1191_v37  ;;  %1277 = vmatpush.bf16.msra.mxu2 %v1889_v35 }
 0x8b4   : > { %v1080_v40 = vsel %vm501_vm2, %v1076_v38, -inf }
 0x8b5   : > { %1081 = vmax.xlane.f32.xlu1 %v1080_v40  ;;  %v1197_v41 = vsel %vm501_vm2, %v1193_v39, -inf }
 0x8b6   : > { %1198 = vmax.xlane.f32.xlu0 %v1197_v41 }
 0x8b7   : > { %v1071_v42 = vpop.f32.mrf.mxu2 }
 0x8b8   : > { %v1188_v43 = vpop.f32.mrf.mxu3 }
 0x8bf   : > { %v1163_v44 = vpop.f32.mrf.mxu2 }
 0x8c0   : > { %v1190_v45 = vmul.f32 0.25, %v1163_v44 }
 0x8c2   : > { %v1192_v46 = vadd.f32 %v2101_v27, %v1190_v45 }
 0x8c4   : > { %v1194_v47 = vsel %vm501_vm2, %v1192_v46, -inf }
 0x8c5   : > { %1195 = vmax.xlane.f32.xlu2 %v1194_v47 }
 0x8c7   : > { %v1165_v48 = vpop.f32.mrf.mxu2 }
 0x8c8   : > { %v1309_v48 = vperm.slane %v2203_v3, 2 }
 0x8ca   : > { %1101 = vrot.lane.b32.xlu0 %v1027_v11, %s1987_s21 }
 0x8d2   : > { %1218 = vrot.lane.b32.xlu0 %v1027_v11, %s1988_s22 }
 0x91a   : > { %v1079_v33 = vpop.xlane.xlu0 %1078 }
 0x91b   : > { %v1083_v49 = vsub.f32 %v1075_v30, %v1079_v33 }
 0x91d   : > { %v1085_v50 = vmul.f32 1.442695, %v1083_v49 }
 0x91f   : > { %1948 = vpow2.f32 %v1085_v50 }
 0x925   : > { %v1949_v51 = vpop.eup %1948 }
 0x926   : > { %v1089_v52 = vsel %vm501_vm2, %v1949_v51, 0.0 }
 0x927   : > { %1090 = vadd.xlane.f32.xlu1 %v1089_v52 }
 0x928   : > { %v1082_v53 = vpop.xlane.xlu1 %1081 }
 0x929   : > { %v1084_v54 = vsub.f32 %v1076_v38, %v1082_v53  ;;  %v1199_v55 = vpop.xlane.xlu0 %1198 }
 0x92a   : > { %v1201_v56 = vsub.f32 %v1193_v39, %v1199_v55 }
 0x92b   : > { %v1087_v27 = vmul.f32 1.442695, %v1084_v54 }
 0x92c   : > { %v1204_v57 = vmul.f32 1.442695, %v1201_v56 }
 0x92d   : > { %1950 = vpow2.f32 %v1087_v27 }
 0x92e   : > { %1952 = vpow2.f32 %v1204_v57 }
 0x933   : > { %v1951_v58 = vpop.eup %1950 }
 0x934   : > { %v1092_v59 = vsel %vm501_vm2, %v1951_v58, 0.0  ;;  %v1953_v61 = vpop.eup %1952 }
 0x935   : > { %1093 = vadd.xlane.f32.xlu2 %v1092_v59  ;;  %v1209_v6 = vsel %vm501_vm2, %v1953_v61, 0.0 }
 0x938   : > { %v1196_v60 = vpop.xlane.xlu2 %1195 }
 0x939   : > { %v1200_v62 = vsub.f32 %v1192_v46, %v1196_v60 }
 0x93b   : > { %v1202_v63 = vmul.f32 1.442695, %v1200_v62 }
 0x93c   : > { %v1102_v2 = vpop.permute.xlu0 %1101 }
 0x93d   : > { %1954 = vpow2.f32 %v1202_v63  ;;  %v1107_v7 = vsel %vm531_vm3, %v1102_v2, 0  ;;  %1210 = vadd.xlane.f32.xlu2 %v1209_v6  ;;  %v1893_v2 = vld [vmem:[%s2158_s9 + $0x18] sm:$0xff] }
 0x93e   : > { %1116 = vmatpush.bf16.msra.mxu0 %v1107_v7 }
 0x940   : > { %1122 = vrot.lane.b32.xlu1 %v2208_v16, %s1987_s21 }
 0x943   : > { %v1955_v8 = vpop.eup %1954 }
 0x944   : > { %v1219_v9 = vpop.permute.xlu0 %1218  ;;  %v1206_v10 = vsel %vm501_vm2, %v1955_v8, 0.0 }
 0x945   : > { %v1224_v5 = vsel %vm531_vm3, %v1219_v9, 0  ;;  %1207 = vadd.xlane.f32.xlu2 %v1206_v10  ;;  %v1892_v9 = vld [vmem:[%s2158_s9 + $0x10] sm:$0xff] }
 0x946   : > { %1233 = vmatpush.bf16.msrb.mxu0 %v1224_v5 }
 0x95d   : > { %1239 = vrot.lane.b32.xlu2 %v2208_v16, %s1988_s22 }
 0x99a   : > { %v1091_v11 = vpop.xlane.xlu1 %1090 }
 0x99b   : > { %1956 = vrcp.f32 %v1091_v11 }
 0x9a1   : > { %v1957_v12 = vpop.eup %1956 }
 0x9a2   : > { %v1097_v13 = vmul.f32 %v1957_v12, %v1949_v51 }
 0x9a4   : > { %v1099_v14 = vpack.c.bf16 %v1097_v13, %v1097_v13 }
 0x9a6   : > { %1789 = vmatmul.msk.bf16.vlgmr.msra.gmra.mxu0 %vm501_vm2, %v1099_v14 }
 0x9a7   : > { %1390 = vmatpush.bf16.msra.mxu0 %v1893_v2 }
 0x9a8   : > { %v1094_v15 = vpop.xlane.xlu2 %1093 }
 0x9a9   : > { %1958 = vrcp.f32 %v1094_v15 }
 0x9ab   : > { %1391 = vmatpush.bf16.msra.mxu0 %v1892_v9 }
 0x9af   : > { %v1959_v17 = vpop.eup %1958 }
 0x9b0   : > { %v1211_v18 = vpop.xlane.xlu2 %1210  ;;  %v1098_v19 = vmul.f32 %v1959_v17, %v1951_v58 }
 0x9b1   : > { %1960 = vrcp.f32 %v1211_v18 }
 0x9b2   : > { %v1123_v20 = vpop.permute.xlu1 %1122  ;;  %v1100_v22 = vpack.c.bf16 %v1098_v19, %v1098_v19 }
 0x9b3   : > { %v1128_v21 = vsel %vm531_vm3, %v1123_v20, 0 }
 0x9b4   : > { %1137 = vmatpush.bf16.msrb.mxu1 %v1128_v21 }
 0x9b7   : > { %1790 = vmatmul.msk.bf16.vlgmr.msrb.gmra.mxu1 %vm501_vm2, %v1100_v22  ;;  %v1961_v23 = vpop.eup %1960 }
 0x9b8   : > { %v1208_v16 = vpop.xlane.xlu2 %1207  ;;  %v1215_v28 = vmul.f32 %v1961_v23, %v1953_v61 }
 0x9b9   : > { %1962 = vrcp.f32 %v1208_v16 }
 0x9ba   : > { %v1217_v31 = vpack.c.bf16 %v1215_v28, %v1215_v28 }
 0x9bf   : > { %v1963_v24 = vpop.eup %1962 }
 0x9c0   : > { %v1214_v25 = vmul.f32 %v1963_v24, %v1955_v8  ;;  %v1240_v26 = vpop.permute.xlu2 %1239  ;;  %v1356_v24 = vperm.slane %v2203_v3, 3 }
 0x9c1   : > { %v1245_v29 = vsel %vm531_vm3, %v1240_v26, 0 }
 0x9c2   : > { %v1216_v30 = vpack.c.bf16 %v1214_v25, %v1214_v25  ;;  %1254 = vmatpush.bf16.msra.mxu1 %v1245_v29  ;;  %v1359_v29 = vperm.slane %v2203_v3, 4 }
 0x9c4   : > { %1793 = vmatmul.msk.bf16.vlgmr.msrb.gmra.mxu0 %vm501_vm2, %v1216_v30 }
 0x9c7   : > { %1794 = vmatmul.msk.bf16.vlgmr.msra.gmra.mxu1 %vm501_vm2, %v1217_v31 }
 0xa23   : > { %v1118_v34 = vpop.f32.mrf.mxu0 }
 0xa2b   : > { %v1120_v36 = vpop.f32.mrf.mxu0 }
 0xa34   : > { %v1139_v37 = vpop.f32.mrf.mxu1 }
 0xa35   : > { %v1143_v38 = vpack.c.bf16 %v1139_v37, %v1118_v34  ;;  %v1901_v37 = vld [vmem:[%s2171_s12 + $0x78] sm:$0xff] }
 0xa36   : > { %1483 = vmatpush.bf16.msrb.mxu1 %v1901_v37 }
 0xa37   : > { %1804 = vmatmul.msk.bf16.vlgmr.msrb.gmra.mxu3 %vm453_vm1, %v1143_v38  ;;  %v1900_v38 = vld [vmem:[%s2171_s12 + $0x70] sm:$0xff] }
 0xa3a   : > { %1484 = vmatpush.bf16.msrb.mxu1 %v1900_v38 }
 0xa3c   : > { %v1141_v39 = vpop.f32.mrf.mxu1 }
 0xa3d   : > { %v1899_v39 = vld [vmem:[%s2171_s12 + $0x68] sm:$0xff] }
 0xa3e   : > { %1485 = vmatpush.bf16.msrb.mxu1 %v1899_v39 }
 0xa41   : > { %v1235_v40 = vpop.f32.mrf.mxu0 }
 0xa44   : > { %v1256_v41 = vpop.f32.mrf.mxu1 }
 0xa45   : > { %v1260_v42 = vpack.c.bf16 %v1256_v41, %v1235_v40  ;;  %v1898_v40 = vld [vmem:[%s2171_s12 + $0x60] sm:$0xff]  ;;  %v1897_v41 = vld [vmem:[%s2171_s12 + $0x58] sm:$0xff] }
 0xa46   : > { %1486 = vmatpush.bf16.msrb.mxu1 %v1898_v40 }
 0xa47   : > { %1799 = vmatmul.msk.bf16.vlgmr.msra.gmra.mxu2 %vm453_vm1, %v1260_v42  ;;  %v1896_v42 = vld [vmem:[%s2171_s12 + $0x50] sm:$0xff] }
 0xa49   : > { %v1237_v43 = vpop.f32.mrf.mxu0 }
 0xa4a   : > { %1487 = vmatpush.bf16.msrb.mxu1 %v1897_v41  ;;  %v1895_v43 = vld [vmem:[%s2171_s12 + $0x48] sm:$0xff] }
 0xa4c   : > { %v1258_v44 = vpop.f32.mrf.mxu1 }
 0xa4d   : > { %v1894_v44 = vld [vmem:[%s2171_s12 + $0x40] sm:$0xff] }
 0xa4e   : > { %1488 = vmatpush.bf16.msrb.mxu1 %v1896_v42 }
 0xa52   : > { %1489 = vmatpush.bf16.msrb.mxu1 %v1895_v43 }
 0xa56   : > { %1490 = vmatpush.bf16.msrb.mxu1 %v1894_v44  ;;  %v1543_v44 = vperm.slane %v2203_v3, 6 }
 0xaba   : > { %v1302_v45 = vpop.f32.mrf.mxu3 }
 0xac2   : > { %v1304_v51 = vpop.f32.mrf.mxu3 }
 0xaca   : > { %v1279_v46 = vpop.f32.mrf.mxu2 }
 0xacb   : > { %v1303_v47 = vadd.f32 %v1302_v45, %v1279_v46  ;;  %v1368_v45 = vperm.slane %v2203_v3, 1 }
 0xacd   : > { %v1307_v33 = vadd.f32 %v1303_v47, %v2195_v1 }
 0xacf   : > { %v1310_v49 = vadd.f32 %v1309_v48, %v1307_v33 }
 0xad1   : > { %v1312_v50 = vsel %vm428_vm0, %v1310_v49, 0.0 }
 0xad2   : > { %1313 = vadd.xlane.f32.xlu1 %v1312_v50  ;;  %v1281_v52 = vpop.f32.mrf.mxu2 }
 0xad3   : > { %v1305_v53 = vadd.f32 %v1304_v51, %v1281_v52 }
 0xad5   : > { %v1308_v54 = vadd.f32 %v1305_v53, %v2197_v4 }
 0xad7   : > { %v1311_v55 = vadd.f32 %v1309_v48, %v1308_v54 }
 0xad9   : > { %v1315_v27 = vsel %vm428_vm0, %v1311_v55, 0.0 }
 0xada   : > { %1316 = vadd.xlane.f32.xlu0 %v1315_v27 }
 0xb45   : > { %v1314_v56 = vpop.xlane.xlu1 %1313 }
 0xb46   : > { %v1318_v57 = vmul.f32 %v1314_v56, %v2148_v0 }
 0xb48   : > { %v1320_v58 = vsub.f32 %v1310_v49, %v1318_v57 }
 0xb4a   : > { %v1322_v1 = vmul.f32 %v1320_v58, %v1320_v58 }
 0xb4c   : > { %v1324_v59 = vsel %vm428_vm0, %v1322_v1, 0.0 }
 0xb4d   : > { %1325 = vadd.xlane.f32.xlu2 %v1324_v59  ;;  %v1317_v60 = vpop.xlane.xlu0 %1316 }
 0xb4e   : > { %v1319_v61 = vmul.f32 %v1317_v60, %v2148_v0 }
 0xb50   : > { %v1321_v62 = vsub.f32 %v1311_v55, %v1319_v61 }
 0xb52   : > { %v1323_v63 = vmul.f32 %v1321_v62, %v1321_v62 }
 0xb54   : > { %v1327_v4 = vsel %vm428_vm0, %v1323_v63, 0.0 }
 0xb55   : > { %1328 = vadd.xlane.f32.xlu1 %v1327_v4 }
 0xbc0   : > { %v1326_v6 = vpop.xlane.xlu2 %1325 }
 0xbc1   : > { %v1330_v7 = vmul.f32 %v1326_v6, %v2148_v0  ;;  %v1434_v6 = vperm.slane %v2203_v3, 5 }
 0xbc3   : > { %v1332_v8 = vadd.f32 1e-12, %v1330_v7 }
 0xbc5   : > { %1964 = vrsqrt.f32 %v1332_v8  ;;  %vm1340_vm2 = vweird.f32 %v1332_v8 }
 0xbc8   : > { %v1329_v10 = vpop.xlane.xlu1 %1328 }
 0xbc9   : > { %v1331_v5 = vmul.f32 %v1329_v10, %v2148_v0 }
 0xbcb   : > { %v1965_v11 = vpop.eup %1964  ;;  %v1333_v12 = vadd.f32 1e-12, %v1331_v5 }
 0xbcc   : > { %v1335_v13 = vmul.f32 %v1965_v11, %v1332_v8  ;;  %vm1341_vm1 = vweird.f32 %v1965_v11 }
 0xbcd   : > { %1966 = vrsqrt.f32 %v1333_v12  ;;  %vm1342_vm3 = vmor %vm1340_vm2, %vm1341_vm1  ;;  %vm1350_vm6 = vweird.f32 %v1333_v12 }
 0xbce   : > { %v1336_v14 = vmul.f32 %v1965_v11, %v1335_v13 }
 0xbd0   : > { %v1337_v15 = vmul.f32 0.5, %v1336_v14 }
 0xbd2   : > { %v1338_v17 = vsub.f32 1.5, %v1337_v15 }
 0xbd3   : > { %v1967_v18 = vpop.eup %1966 }
 0xbd4   : > { %v1339_v19 = vmul.f32 %v1965_v11, %v1338_v17  ;;  %v1345_v20 = vmul.f32 %v1967_v18, %v1333_v12  ;;  %vm1351_vm5 = vweird.f32 %v1967_v18 }
 0xbd5   : > { %vm1352_vm7 = vmor %vm1350_vm6, %vm1351_vm5 }
 0xbd6   : > { %v1346_v21 = vmul.f32 %v1967_v18, %v1345_v20  ;;  %v1343_v22 = vsel %vm1342_vm3, %v1965_v11, %v1339_v19 }
 0xbd7   : > { %v1354_v25 = vmul.f32 %v1343_v22, %v1320_v58 }
 0xbd8   : > { %v1347_v16 = vmul.f32 0.5, %v1346_v21 }
 0xbd9   : > { %v1357_v30 = vmul.f32 %v1356_v24, %v1354_v25 }
 0xbda   : > { %v1348_v23 = vsub.f32 1.5, %v1347_v16 }
 0xbdb   : > { %v1360_v34 = vadd.f32 %v1359_v29, %v1357_v30 }
 0xbdc   : > { %v1349_v26 = vmul.f32 %v1967_v18, %v1348_v23 }
 0xbde   : > { %v1353_v28 = vsel %vm1352_vm7, %v1967_v18, %v1349_v26 }
 0xbdf   : > { %v1355_v31 = vmul.f32 %v1353_v28, %v1321_v62 }
 0xbe1   : > { %v1358_v32 = vmul.f32 %v1356_v24, %v1355_v31 }
 0xbe3   : > { %v1361_v35 = vadd.f32 %v1359_v29, %v1358_v32 }
 0xbe5   : > { %v1362_v36 = vpack.c.bf16 %v1361_v35, %v1360_v34 }
 0xbe7   : > { %1817 = vmatmul.msk.bf16.vlgmr.msra.gmra.mxu0 %vm428_vm0, %v1362_v36 }
 0xc64   : > { %v1393_v46 = vpop.f32.mrf.mxu0 }
 0xc65   : > { %v1394_v47 = vadd.f32 %v1393_v46, %v1368_v45 }
 0xc67   : > { %v1400_v48 = vmul.f32 0.044715, %v1394_v47  ;;  %v1398_v60 = vmul.f32 0.5, %v1394_v47 }
 0xc69   : > { %v1402_v33 = vmul.f32 %v1400_v48, %v1394_v47  ;;  %v1546_v48 = vperm.slane %v2203_v3, 7 }
 0xc6b   : > { %v1404_v49 = vmul.f32 %v1402_v33, %v1394_v47 }
 0xc6c   : > { %v1395_v50 = vpop.f32.mrf.mxu0 }
 0xc6d   : > { %v1406_v51 = vadd.f32 %v1404_v49, %v1394_v47  ;;  %v1396_v52 = vadd.f32 %v1395_v50, %v1368_v45 }
 0xc6f   : > { %v1401_v53 = vmul.f32 0.044715, %v1396_v52  ;;  %v1408_v54 = vmul.f32 0.7978846, %v1406_v51  ;;  %v1399_v61 = vmul.f32 0.5, %v1396_v52 }
 0xc71   : > { %v1403_v55 = vmul.f32 %v1401_v53, %v1396_v52  ;;  %1968 = vtanh.f32 %v1408_v54 }
 0xc73   : > { %v1405_v27 = vmul.f32 %v1403_v55, %v1396_v52 }
 0xc75   : > { %v1407_v56 = vadd.f32 %v1405_v27, %v1396_v52 }
 0xc77   : > { %v1409_v57 = vmul.f32 0.7978846, %v1407_v56  ;;  %v1969_v58 = vpop.eup %1968 }
 0xc78   : > { %v1412_v1 = vadd.f32 1.0, %v1969_v58 }
 0xc79   : > { %1970 = vtanh.f32 %v1409_v57 }
 0xc7a   : > { %v1414_v63 = vmul.f32 %v1412_v1, %v1398_v60 }
 0xc7f   : > { %v1971_v59 = vpop.eup %1970 }
 0xc80   : > { %v1413_v62 = vadd.f32 1.0, %v1971_v59 }
 0xc82   : > { %v1415_v4 = vmul.f32 %v1413_v62, %v1399_v61 }
 0xc84   : > { %v1416_v2 = vpack.c.bf16 %v1415_v4, %v1414_v63 }
 0xc86   : > { %1491 = vmatmul.bf16.vlgmr.msrb.gmra.mxu1 %v1416_v2 }
 0xd03   : > { %v1492_v7 = vpop.f32.mrf.mxu1 }
 0xd04   : > { %v1493_v8 = vadd.f32 %v1492_v7, %v1434_v6 }
 0xd06   : > { %v1497_v9 = vadd.f32 %v1493_v8, %v1360_v34 }
 0xd08   : > { %v1499_v10 = vsel %vm428_vm0, %v1497_v9, 0.0 }
 0xd09   : > { %1500 = vadd.xlane.f32.xlu1 %v1499_v10 }
 0xd0b   : > { %v1494_v5 = vpop.f32.mrf.mxu1 }
 0xd0c   : > { %v1495_v11 = vadd.f32 %v1494_v5, %v1434_v6 }
 0xd0e   : > { %v1498_v12 = vadd.f32 %v1495_v11, %v1361_v35 }
 0xd10   : > { %v1502_v13 = vsel %vm428_vm0, %v1498_v12, 0.0 }
 0xd11   : > { %1503 = vadd.xlane.f32.xlu0 %v1502_v13 }
 0xd7c   : > { %v1501_v14 = vpop.xlane.xlu1 %1500 }
 0xd7d   : > { %v1505_v15 = vmul.f32 %v1501_v14, %v2148_v0 }
 0xd7f   : > { %v1507_v17 = vsub.f32 %v1497_v9, %v1505_v15 }
 0xd81   : > { %v1509_v18 = vmul.f32 %v1507_v17, %v1507_v17 }
 0xd83   : > { %v1511_v19 = vsel %vm428_vm0, %v1509_v18, 0.0 }
 0xd84   : > { %v1504_v20 = vpop.xlane.xlu0 %1503  ;;  %1512 = vadd.xlane.f32.xlu1 %v1511_v19 }
 0xd85   : > { %v1506_v21 = vmul.f32 %v1504_v20, %v2148_v0 }
 0xd87   : > { %v1508_v22 = vsub.f32 %v1498_v12, %v1506_v21 }
 0xd89   : > { %v1510_v16 = vmul.f32 %v1508_v22, %v1508_v22 }
 0xd8b   : > { %v1514_v23 = vsel %vm428_vm0, %v1510_v16, 0.0 }
 0xd8c   : > { %1515 = vadd.xlane.f32.xlu0 %v1514_v23 }
 0xdf7   : > { %v1513_v24 = vpop.xlane.xlu1 %1512 }
 0xdf8   : > { %v1517_v25 = vmul.f32 %v1513_v24, %v2148_v0 }
 0xdfa   : > { %v1519_v26 = vadd.f32 1e-12, %v1517_v25 }
 0xdfc   : > { %1972 = vrsqrt.f32 %v1519_v26  ;;  %vm1527_vm8 = vweird.f32 %v1519_v26 }
 0xdff   : > { %v1516_v28 = vpop.xlane.xlu0 %1515 }
 0xe00   : > { %v1518_v29 = vmul.f32 %v1516_v28, %v2148_v0 }
 0xe02   : > { %v1973_v30 = vpop.eup %1972  ;;  %v1520_v31 = vadd.f32 1e-12, %v1518_v29 }
 0xe03   : > { %v1522_v32 = vmul.f32 %v1973_v30, %v1519_v26  ;;  %vm1528_vm0 = vweird.f32 %v1973_v30 }
 0xe04   : > { %1974 = vrsqrt.f32 %v1520_v31  ;;  %vm1529_vm9 = vmor %vm1527_vm8, %vm1528_vm0  ;;  %vm1537_vm11 = vweird.f32 %v1520_v31 }
 0xe05   : > { %v1523_v34 = vmul.f32 %v1973_v30, %v1522_v32 }
 0xe07   : > { %v1524_v35 = vmul.f32 0.5, %v1523_v34 }
 0xe09   : > { %v1525_v36 = vsub.f32 1.5, %v1524_v35 }
 0xe0a   : > { %v1975_v37 = vpop.eup %1974 }
 0xe0b   : > { %v1532_v38 = vmul.f32 %v1975_v37, %v1520_v31  ;;  %v1526_v39 = vmul.f32 %v1973_v30, %v1525_v36  ;;  %vm1538_vm10 = vweird.f32 %v1975_v37 }
 0xe0c   : > { %vm1539_vm12 = vmor %vm1537_vm11, %vm1538_vm10 }
 0xe0d   : > { %v1533_v40 = vmul.f32 %v1975_v37, %v1532_v38  ;;  %v1530_v42 = vsel %vm1529_vm9, %v1973_v30, %v1526_v39 }
 0xe0e   : > { %v1541_v45 = vmul.f32 %v1530_v42, %v1507_v17 }
 0xe0f   : > { %v1534_v41 = vmul.f32 0.5, %v1533_v40 }
 0xe10   : > { %v1544_v33 = vmul.f32 %v1543_v44, %v1541_v45 }
 0xe11   : > { %v1535_v43 = vsub.f32 1.5, %v1534_v41 }
 0xe12   : > { %v1547_v51 = vadd.f32 %v1546_v48, %v1544_v33 }
 0xe13   : > { %v1536_v0 = vmul.f32 %v1975_v37, %v1535_v43 }
 0xe15   : > { %v1540_v46 = vsel %vm1539_vm12, %v1975_v37, %v1536_v0 }
 0xe16   : > { %v1542_v47 = vmul.f32 %v1540_v46, %v1508_v22 }
 0xe18   : > { %v1545_v49 = vmul.f32 %v1543_v44, %v1542_v47 }
 0xe1a   : > { %v1548_v50 = vadd.f32 %v1546_v48, %v1545_v49 }
 0xe1c   : > { %v1551_v52 = vrot.slane %v1548_v50, 7 }
 0xe1e   : > { %v1553_v53 = vsel %vm1552_vm13, %v1551_v52, %v1547_v51 }
 0xe1f   : > { %1556 = vst.msk [vmem:[%s393_s14] sm:$0x3] %vm1555_vm14, %v1553_v53 }
 0xe20 PF: > { %s17_s24 = sadd.s32 1, %s1982_s24  }
 0xe21   : > { %p14_p4 = scmp.ge.s32.totalorder %s17_s24, 4  }
 0xe23   :  { %16 = sbr.rel (!%p14_p4) target bundleno = 1 (0x1), region = 101 }

</bundles_post_ra>
